<compile_context>
chip_gen: v7x
topology: tpu7x:2x2x1
jax: 0.10.0
libtpu: 0.0.40
codegen_flags: <defaults>
</compile_context>

<pallas_src>
import math

import jax
import jax.numpy as jnp
from jax.experimental import pallas as pl
from jax.experimental.pallas import tpu as pltpu


def ccfm_kernel(xp_ref, xd_ref, pbias_ref, dbias_ref,
                wpT_ref, bp_ref, wdT_ref, bd_ref, wallT_ref,
                wkpT_ref, wkdT_ref, ssc_ref, st_ref,
                out_ref):
    f32 = jnp.float32
    xp3 = xp_ref[...]                      # (bt, Lp, D) protein tokens (this tile)
    xd3 = xd_ref[...]                      # (bt, Ld, D) drug tokens (this tile)
    bt, Lp, D = xp3.shape
    Ld = xd3.shape[1]
    H = ssc_ref.shape[1]

    def dot(a, b):
        return jnp.dot(a, b, preferred_element_type=f32)

    # ---- global context: mean-pool (1/L folded into wpT/wdT) -> Linear -> ReLU
    g_p = jnp.maximum(dot(jnp.sum(xp3, axis=1), wpT_ref[...]) + bp_ref[...], 0.0)  # (bt, D)
    g_d = jnp.maximum(dot(jnp.sum(xd3, axis=1), wdT_ref[...]) + bd_ref[...], 0.0)  # (bt, D)

    # ---- fused conditioning query: q = concat([g_p, g_d]) @ wall.T  (no bias)
    g_all = jnp.concatenate([g_p, g_d], axis=-1).astype(wallT_ref.dtype)           # (bt, 2D)
    q = dot(g_all, wallT_ref[...])                                                  # (bt, D)

    def branch(x3, L, wkT, bias3):
        # keys for every row of the tile in one lane-dense matmul
        x2 = x3.reshape(bt * L, D)
        k3 = dot(x2, wkT).reshape(bt, L, D)                    # (bt, L, D), f32
        # per-segment query broadcast (replaces the old (R, bt) expansion matmul)
        kq = k3 * q[:, None, :]                                # (bt, L, D)
        # per-head scores via head-membership matmul; 1/sqrt(hd) folded into Ssc
        s = dot(kq.reshape(bt * L, D), ssc_ref[...]).reshape(bt, L, H)
        s = s + bias3                                          # additive -1e9 mask bias
        # per-segment, per-head softmax over the sequence axis.  Matches the
        # reference exactly: masked entries underflow to 0, and a fully-masked
        # segment gives s - m == 0 everywhere -> uniform weights, denom >= 1.
        m = jnp.max(s, axis=1, keepdims=True)                  # (bt, 1, H)
        e = jnp.exp(s - m)                                     # (bt, L, H)
        z = jnp.sum(e, axis=1)                                 # (bt, H), always >= 1
        w = e * pl.reciprocal(z, approx=False)[:, None, :]     # normalized attention
        # expand per-head weights to per-feature and reduce over the sequence
        wD = dot(w.reshape(bt * L, H), st_ref[...]).reshape(bt, L, D)
        # TODO(synk): for very long sequences, chunk this branch over L with an
        # inner lax.fori_loop + VMEM accumulators to bound live intermediates.
        return jnp.sum(wD * x3.astype(f32), axis=1)            # (bt, D)

    rep_p = branch(xp3, Lp, wkpT_ref[...], pbias_ref[...])
    rep_d = branch(xd3, Ld, wkdT_ref[...], dbias_ref[...])
    out_ref[...] = (rep_p + rep_d).astype(out_ref.dtype)


def _pick_batch_tile(bs, Lp, Ld, D, itemsize, vmem_budget_bytes):
    """Largest bt dividing bs whose per-step working set fits the budget,
    preferring an even number of tiles (>= 2) so both v7x TensorCores get work."""
    # per batch element: double-buffered token inputs + ~8 f32 (L, D) temporaries
    per_b = 2 * (Lp + Ld) * D * itemsize + 8 * (Lp + Ld) * D * 4
    cap = max(1, vmem_budget_bytes // max(per_b, 1))
    divisors = [d for d in range(1, bs + 1) if bs % d == 0 and d <= cap] or [1]
    for want_even in (True, False):
        cands = [d for d in divisors
                 if (bs // d) >= 2 and ((bs // d) % 2 == 0 or not want_even)]
        if cands:
            return max(cands)
    return max(divisors)


def ccfm_forward(x_p, x_d, p_mask, d_mask, params, num_head,
                 batch_tile=None, use_bf16=False):
    f32 = jnp.float32
    bs, Lp, D = x_p.shape
    Ld = x_d.shape[1]
    H = num_head
    assert D % H == 0
    hd = D // H

    wp, bp, wd, bd, wall, wkp, wkd = params
    in_dtype = jnp.bfloat16 if use_bf16 else f32
    itemsize = 2 if use_bf16 else 4

    # --- VMEM budget, re-derived per TPU generation (v5e/v6e 128 MiB, v7x 64 MiB)
    vmem_cap = 64 * 1024 * 1024                    # conservative default (v7x)
    try:
        info = pltpu.get_tpu_info()
        cap = getattr(info, "vmem_capacity_bytes", None)
        if cap:
            vmem_cap = int(cap)
    except Exception:
        pass
    vmem_limit = int(min(0.75 * vmem_cap, 112 * 1024 * 1024))

    bt = _pick_batch_tile(bs, Lp, Ld, D, itemsize, vmem_limit // 3) \
        if batch_tile is None else batch_tile
    assert bs % bt == 0, "batch_tile must divide the batch size"
    nt = bs // bt

    # --- wrapper-side prep (trace time, free) --------------------------------
    wpT = (wp.T / Lp).astype(in_dtype)             # mean-pool 1/Lp folded in
    wdT = (wd.T / Ld).astype(in_dtype)             # mean-pool 1/Ld folded in
    wallT = wall.T.astype(in_dtype)                # (2D, D) fused q projection
    wkpT = wkp.T.astype(in_dtype)
    wkdT = wkd.T.astype(in_dtype)
    bp2 = bp.reshape(1, D).astype(f32)
    bd2 = bd.reshape(1, D).astype(f32)

    xp = x_p.astype(in_dtype)
    xd = x_d.astype(in_dtype)
    pbias = (p_mask.astype(f32) * (-1000000000.0)).reshape(bs, Lp, 1)
    dbias = (d_mask.astype(f32) * (-1000000000.0)).reshape(bs, Ld, 1)

    # head-membership matrix (1/sqrt(hd) folded in) and its transpose; f32
    dcol = jnp.arange(D)[:, None] // hd
    S = (dcol == jnp.arange(H)[None, :]).astype(f32)   # (D, H)
    Ssc = S / math.sqrt(hd)
    ST = S.T                                            # (H, D)

    const2 = lambda i: (0, 0)

    grid_spec = pltpu.PrefetchScalarGridSpec(
        num_scalar_prefetch=0,
        grid=(nt,),
        in_specs=[
            pl.BlockSpec((bt, Lp, D), lambda i: (i, 0, 0)),   # x_p tile
            pl.BlockSpec((bt, Ld, D), lambda i: (i, 0, 0)),   # x_d tile
            pl.BlockSpec((bt, Lp, 1), lambda i: (i, 0, 0)),   # protein mask bias
            pl.BlockSpec((bt, Ld, 1), lambda i: (i, 0, 0)),   # drug mask bias
            pl.BlockSpec((D, D), const2),                     # wpT (scaled)
            pl.BlockSpec((1, D), const2),                     # bp
            pl.BlockSpec((D, D), const2),                     # wdT (scaled)
            pl.BlockSpec((1, D), const2),                     # bd
            pl.BlockSpec((2 * D, D), const2),                 # wallT (fused)
            pl.BlockSpec((D, D), const2),                     # wkpT
            pl.BlockSpec((D, D), const2),                     # wkdT
            pl.BlockSpec((D, H), const2),                     # Ssc
            pl.BlockSpec((H, D), const2),                     # ST
        ],
        # 3-D output so the block's last two dims equal the array dims
        # (lane-dense, unmasked stores even when bt is not a multiple of 8).
        out_specs=pl.BlockSpec((None, bt, D), lambda i: (i, 0, 0)),
    )

    out = pl.pallas_call(
        ccfm_kernel,
        out_shape=jax.ShapeDtypeStruct((nt, bt, D), f32),
        grid_spec=grid_spec,
        compiler_params=pltpu.CompilerParams(
            dimension_semantics=("parallel",),
            vmem_limit_bytes=vmem_limit,
        ),
    )(xp, xd, pbias, dbias, wpT, bp2, wdT, bd2, wallT, wkpT, wkdT, Ssc, ST)
    return out.reshape(bs, D)


def ccfm_reference(x_p, x_d, p_mask, d_mask, params, num_head):
    """Pure-JAX reference mirroring the PyTorch forward exactly."""
    wp, bp, wd, bd, wall, wkp, wkd = params
    bs, Lp, D = x_p.shape
    Ld = x_d.shape[1]
    hd = D // num_head

    g_p = jnp.maximum(jnp.mean(x_p, axis=1, keepdims=True) @ wp.T + bp, 0.0)
    g_d = jnp.maximum(jnp.mean(x_d, axis=1, keepdims=True) @ wd.T + bd, 0.0)
    g_all = jnp.concatenate([g_p, g_d], -1)
    q = (g_all @ wall.T).reshape(bs, 1, num_head, hd).transpose(0, 2, 1, 3)      # (B,H,1,hd)
    k_p = (x_p @ wkp.T).reshape(bs, Lp, num_head, hd).transpose(0, 2, 1, 3)      # (B,H,Lp,hd)
    k_d = (x_d @ wkd.T).reshape(bs, Ld, num_head, hd).transpose(0, 2, 1, 3)
    v_p = x_p.reshape(bs, Lp, num_head, hd).transpose(0, 2, 1, 3)
    v_d = x_d.reshape(bs, Ld, num_head, hd).transpose(0, 2, 1, 3)

    p_scores = jnp.einsum('bhld,bhqd->bhlq', k_p, q) / math.sqrt(hd)             # (B,H,Lp,1)
    p_scores = jnp.where(p_mask[:, None, :, None], -1000000000.0, p_scores)
    d_scores = jnp.einsum('bhld,bhqd->bhlq', k_d, q) / math.sqrt(hd)
    d_scores = jnp.where(d_mask[:, None, :, None], -1000000000.0, d_scores)

    attn_p = jax.nn.softmax(p_scores, axis=2)
    attn_d = jax.nn.softmax(d_scores, axis=2)

    rep_p = (v_p * attn_p).transpose(0, 2, 1, 3).reshape(bs, Lp, D).sum(axis=1)
    rep_d = (v_d * attn_d).transpose(0, 2, 1, 3).reshape(bs, Ld, D).sum(axis=1)
    return rep_p + rep_d


if __name__ == "__main__":
    # module-default dim_model=128 / num_head=4; small batch & sequence lengths.
    bs, Lp, Ld, D, H = 8, 16, 24, 128, 4

    key = jax.random.PRNGKey(0)
    keys = jax.random.split(key, 11)

    x_p = jax.random.normal(keys[0], (bs, Lp, D), dtype=jnp.float32)
    x_d = jax.random.normal(keys[1], (bs, Ld, D), dtype=jnp.float32)
    p_mask = jax.random.bernoulli(keys[2], 0.25, (bs, Lp))   # True == masked
    d_mask = jax.random.bernoulli(keys[3], 0.25, (bs, Ld))

    scale = 0.1
    wp = scale * jax.random.normal(keys[4], (D, D), dtype=jnp.float32)
    bp = scale * jax.random.normal(keys[5], (D,), dtype=jnp.float32)
    wd = scale * jax.random.normal(keys[6], (D, D), dtype=jnp.float32)
    bd = scale * jax.random.normal(keys[7], (D,), dtype=jnp.float32)
    wall = scale * jax.random.normal(keys[8], (D, 2 * D), dtype=jnp.float32)
    wkp = scale * jax.random.normal(keys[9], (D, D), dtype=jnp.float32)
    wkd = scale * jax.random.normal(keys[10], (D, D), dtype=jnp.float32)
    params = (wp, bp, wd, bd, wall, wkp, wkd)

    out = ccfm_forward(x_p, x_d, p_mask, d_mask, params, num_head=H)
    out = jax.block_until_ready(out)

    ref = ccfm_reference(x_p, x_d, p_mask, d_mask, params, num_head=H)
    assert out.shape == (bs, D)
    assert jnp.allclose(out, ref, rtol=1e-5, atol=3e-5), (
        f"mismatch: max abs err = {jnp.max(jnp.abs(out - ref))}")

    print("KERNEL_OK")
</pallas_src>

<mosaic_0001>
module attributes {stable_mosaic.version = 11 : i64} {
  func.func @ccfm_kernel(%arg0: i32, %arg1: memref<4x16x128xf32, #tpu.memory_space<vmem>>, %arg2: memref<4x24x128xf32, #tpu.memory_space<vmem>>, %arg3: memref<4x16x1xf32, #tpu.memory_space<vmem>>, %arg4: memref<4x24x1xf32, #tpu.memory_space<vmem>>, %arg5: memref<128x128xf32, #tpu.memory_space<vmem>>, %arg6: memref<1x128xf32, #tpu.memory_space<vmem>>, %arg7: memref<128x128xf32, #tpu.memory_space<vmem>>, %arg8: memref<1x128xf32, #tpu.memory_space<vmem>>, %arg9: memref<256x128xf32, #tpu.memory_space<vmem>>, %arg10: memref<128x128xf32, #tpu.memory_space<vmem>>, %arg11: memref<128x128xf32, #tpu.memory_space<vmem>>, %arg12: memref<128x4xf32, #tpu.memory_space<vmem>>, %arg13: memref<4x128xf32, #tpu.memory_space<vmem>>, %arg14: memref<1x4x128xf32, #tpu.memory_space<vmem>>) attributes {dimension_semantics = [#tpu.dimension_semantics<parallel>], iteration_bounds = array<i64: 2>, scalar_prefetch = 0 : i64, scratch_operands = 0 : i64, tpu.core_type = #tpu.core_type<tc>, window_params = [{transform_indices = @transform_0, window_bounds = array<i64: 4, 16, 128>}, {transform_indices = @transform_1, window_bounds = array<i64: 4, 24, 128>}, {transform_indices = @transform_2, window_bounds = array<i64: 4, 16, 1>}, {transform_indices = @transform_3, window_bounds = array<i64: 4, 24, 1>}, {pipeline_mode = #tpu.pipeline_mode<synchronous>, transform_indices = @transform_4, window_bounds = array<i64: 128, 128>}, {pipeline_mode = #tpu.pipeline_mode<synchronous>, transform_indices = @transform_5, window_bounds = array<i64: 1, 128>}, {pipeline_mode = #tpu.pipeline_mode<synchronous>, transform_indices = @transform_6, window_bounds = array<i64: 128, 128>}, {pipeline_mode = #tpu.pipeline_mode<synchronous>, transform_indices = @transform_7, window_bounds = array<i64: 1, 128>}, {pipeline_mode = #tpu.pipeline_mode<synchronous>, transform_indices = @transform_8, window_bounds = array<i64: 256, 128>}, {pipeline_mode = #tpu.pipeline_mode<synchronous>, transform_indices = @transform_9, window_bounds = array<i64: 128, 128>}, {pipeline_mode = #tpu.pipeline_mode<synchronous>, transform_indices = @transform_10, window_bounds = array<i64: 128, 128>}, {pipeline_mode = #tpu.pipeline_mode<synchronous>, transform_indices = @transform_11, window_bounds = array<i64: 128, 4>}, {pipeline_mode = #tpu.pipeline_mode<synchronous>, transform_indices = @transform_12, window_bounds = array<i64: 4, 128>}, {transform_indices = @transform_13, window_bounds = array<i64: 1, 4, 128>}]} {
    %c0 = arith.constant 0 : index
    %c0_0 = arith.constant 0 : index
    %c0_1 = arith.constant 0 : index
    %0 = vector.load %arg1[%c0, %c0_0, %c0_1] : memref<4x16x128xf32, #tpu.memory_space<vmem>>, vector<4x16x128xf32>
    %c0_2 = arith.constant 0 : index
    %c0_3 = arith.constant 0 : index
    %c0_4 = arith.constant 0 : index
    %1 = vector.load %arg2[%c0_2, %c0_3, %c0_4] : memref<4x24x128xf32, #tpu.memory_space<vmem>>, vector<4x24x128xf32>
    %cst = arith.constant dense<0.000000e+00> : vector<4x128xf32>
    %2 = vector.multi_reduction <add>, %0, %cst [1] : vector<4x16x128xf32> to vector<4x128xf32>
    %c0_5 = arith.constant 0 : index
    %c0_6 = arith.constant 0 : index
    %3 = vector.load %arg5[%c0_5, %c0_6] : memref<128x128xf32, #tpu.memory_space<vmem>>, vector<128x128xf32>
    %cst_7 = arith.constant dense<0.000000e+00> : vector<4x128xf32>
    %4 = tpu.matmul %2, %3, %cst_7 {dimension_numbers = #tpu.dot_dimension_numbers<[1], [0], [0], [1], [0, 0, 1, 1], [], []>} : vector<4x128xf32>, vector<128x128xf32>, vector<4x128xf32> -> vector<4x128xf32>
    %c0_8 = arith.constant 0 : index
    %c0_9 = arith.constant 0 : index
    %5 = vector.load %arg6[%c0_8, %c0_9] : memref<1x128xf32, #tpu.memory_space<vmem>>, vector<1x128xf32>
    %6 = vector.broadcast %5 : vector<1x128xf32> to vector<4x128xf32>
    %7 = arith.addf %4, %6 : vector<4x128xf32>
    %cst_10 = arith.constant 0.000000e+00 : f32
    %8 = vector.broadcast %cst_10 : f32 to vector<4x128xf32>
    %9 = arith.maximumf %7, %8 : vector<4x128xf32>
    %cst_11 = arith.constant dense<0.000000e+00> : vector<4x128xf32>
    %10 = vector.multi_reduction <add>, %1, %cst_11 [1] : vector<4x24x128xf32> to vector<4x128xf32>
    %c0_12 = arith.constant 0 : index
    %c0_13 = arith.constant 0 : index
    %11 = vector.load %arg7[%c0_12, %c0_13] : memref<128x128xf32, #tpu.memory_space<vmem>>, vector<128x128xf32>
    %cst_14 = arith.constant dense<0.000000e+00> : vector<4x128xf32>
    %12 = tpu.matmul %10, %11, %cst_14 {dimension_numbers = #tpu.dot_dimension_numbers<[1], [0], [0], [1], [0, 0, 1, 1], [], []>} : vector<4x128xf32>, vector<128x128xf32>, vector<4x128xf32> -> vector<4x128xf32>
    %c0_15 = arith.constant 0 : index
    %c0_16 = arith.constant 0 : index
    %13 = vector.load %arg8[%c0_15, %c0_16] : memref<1x128xf32, #tpu.memory_space<vmem>>, vector<1x128xf32>
    %14 = vector.broadcast %13 : vector<1x128xf32> to vector<4x128xf32>
    %15 = arith.addf %12, %14 : vector<4x128xf32>
    %cst_17 = arith.constant 0.000000e+00 : f32
    %16 = vector.broadcast %cst_17 : f32 to vector<4x128xf32>
    %17 = arith.maximumf %15, %16 : vector<4x128xf32>
    %18 = tpu.concatenate %9, %17 in 1 : vector<4x128xf32>, vector<4x128xf32> -> vector<4x256xf32>
    %c0_18 = arith.constant 0 : index
    %c0_19 = arith.constant 0 : index
    %19 = vector.load %arg9[%c0_18, %c0_19] : memref<256x128xf32, #tpu.memory_space<vmem>>, vector<256x128xf32>
    %cst_20 = arith.constant dense<0.000000e+00> : vector<4x128xf32>
    %20 = tpu.matmul %18, %19, %cst_20 {dimension_numbers = #tpu.dot_dimension_numbers<[1], [0], [0], [1], [0, 0, 1, 1], [], []>} : vector<4x256xf32>, vector<256x128xf32>, vector<4x128xf32> -> vector<4x128xf32>
    %c0_21 = arith.constant 0 : index
    %c0_22 = arith.constant 0 : index
    %21 = vector.load %arg10[%c0_21, %c0_22] : memref<128x128xf32, #tpu.memory_space<vmem>>, vector<128x128xf32>
    %c0_23 = arith.constant 0 : index
    %c0_24 = arith.constant 0 : index
    %c0_25 = arith.constant 0 : index
    %22 = vector.load %arg3[%c0_23, %c0_24, %c0_25] : memref<4x16x1xf32, #tpu.memory_space<vmem>>, vector<4x16x1xf32>
    %23 = vector.shape_cast %0 : vector<4x16x128xf32> to vector<64x128xf32>
    %cst_26 = arith.constant dense<0.000000e+00> : vector<64x128xf32>
    %24 = tpu.matmul %23, %21, %cst_26 {dimension_numbers = #tpu.dot_dimension_numbers<[1], [0], [0], [1], [0, 0, 1, 1], [], []>} : vector<64x128xf32>, vector<128x128xf32>, vector<64x128xf32> -> vector<64x128xf32>
    %25 = vector.shape_cast %24 : vector<64x128xf32> to vector<4x16x128xf32>
    %26 = vector.shape_cast %20 : vector<4x128xf32> to vector<4x1x128xf32>
    %27 = vector.broadcast %26 : vector<4x1x128xf32> to vector<4x16x128xf32>
    %28 = arith.mulf %25, %27 : vector<4x16x128xf32>
    %29 = vector.shape_cast %28 : vector<4x16x128xf32> to vector<64x128xf32>
    %c0_27 = arith.constant 0 : index
    %c0_28 = arith.constant 0 : index
    %30 = vector.load %arg12[%c0_27, %c0_28] : memref<128x4xf32, #tpu.memory_space<vmem>>, vector<128x4xf32>
    %cst_29 = arith.constant dense<0.000000e+00> : vector<64x4xf32>
    %31 = tpu.matmul %29, %30, %cst_29 {dimension_numbers = #tpu.dot_dimension_numbers<[1], [0], [0], [1], [0, 0, 1, 1], [], []>} : vector<64x128xf32>, vector<128x4xf32>, vector<64x4xf32> -> vector<64x4xf32>
    %32 = vector.shape_cast %31 : vector<64x4xf32> to vector<4x16x4xf32>
    %33 = vector.broadcast %22 : vector<4x16x1xf32> to vector<4x16x4xf32>
    %34 = arith.addf %32, %33 : vector<4x16x4xf32>
    %cst_30 = arith.constant dense<0xFF800000> : vector<4x4xf32>
    %35 = vector.multi_reduction <maximumf>, %34, %cst_30 [1] : vector<4x16x4xf32> to vector<4x4xf32>
    %36 = vector.shape_cast %35 : vector<4x4xf32> to vector<4x1x4xf32>
    %37 = vector.broadcast %36 : vector<4x1x4xf32> to vector<4x16x4xf32>
    %38 = arith.subf %34, %37 : vector<4x16x4xf32>
    %39 = math.exp %38 : vector<4x16x4xf32>
    %cst_31 = arith.constant dense<0.000000e+00> : vector<4x4xf32>
    %40 = vector.multi_reduction <add>, %39, %cst_31 [1] : vector<4x16x4xf32> to vector<4x4xf32>
    %41 = tpu.reciprocal %40 : vector<4x4xf32> -> vector<4x4xf32>
    %42 = vector.shape_cast %41 : vector<4x4xf32> to vector<4x1x4xf32>
    %43 = vector.broadcast %42 : vector<4x1x4xf32> to vector<4x16x4xf32>
    %44 = arith.mulf %39, %43 : vector<4x16x4xf32>
    %45 = vector.shape_cast %44 : vector<4x16x4xf32> to vector<64x4xf32>
    %c0_32 = arith.constant 0 : index
    %c0_33 = arith.constant 0 : index
    %46 = vector.load %arg13[%c0_32, %c0_33] : memref<4x128xf32, #tpu.memory_space<vmem>>, vector<4x128xf32>
    %cst_34 = arith.constant dense<0.000000e+00> : vector<64x128xf32>
    %47 = tpu.matmul %45, %46, %cst_34 {dimension_numbers = #tpu.dot_dimension_numbers<[1], [0], [0], [1], [0, 0, 1, 1], [], []>} : vector<64x4xf32>, vector<4x128xf32>, vector<64x128xf32> -> vector<64x128xf32>
    %48 = vector.shape_cast %47 : vector<64x128xf32> to vector<4x16x128xf32>
    %49 = arith.mulf %48, %0 : vector<4x16x128xf32>
    %cst_35 = arith.constant dense<0.000000e+00> : vector<4x128xf32>
    %50 = vector.multi_reduction <add>, %49, %cst_35 [1] : vector<4x16x128xf32> to vector<4x128xf32>
    %c0_36 = arith.constant 0 : index
    %c0_37 = arith.constant 0 : index
    %51 = vector.load %arg11[%c0_36, %c0_37] : memref<128x128xf32, #tpu.memory_space<vmem>>, vector<128x128xf32>
    %c0_38 = arith.constant 0 : index
    %c0_39 = arith.constant 0 : index
    %c0_40 = arith.constant 0 : index
    %52 = vector.load %arg4[%c0_38, %c0_39, %c0_40] : memref<4x24x1xf32, #tpu.memory_space<vmem>>, vector<4x24x1xf32>
    %53 = vector.shape_cast %1 : vector<4x24x128xf32> to vector<96x128xf32>
    %cst_41 = arith.constant dense<0.000000e+00> : vector<96x128xf32>
    %54 = tpu.matmul %53, %51, %cst_41 {dimension_numbers = #tpu.dot_dimension_numbers<[1], [0], [0], [1], [0, 0, 1, 1], [], []>} : vector<96x128xf32>, vector<128x128xf32>, vector<96x128xf32> -> vector<96x128xf32>
    %55 = vector.shape_cast %54 : vector<96x128xf32> to vector<4x24x128xf32>
    %56 = vector.shape_cast %20 : vector<4x128xf32> to vector<4x1x128xf32>
    %57 = vector.broadcast %56 : vector<4x1x128xf32> to vector<4x24x128xf32>
    %58 = arith.mulf %55, %57 : vector<4x24x128xf32>
    %59 = vector.shape_cast %58 : vector<4x24x128xf32> to vector<96x128xf32>
    %c0_42 = arith.constant 0 : index
    %c0_43 = arith.constant 0 : index
    %60 = vector.load %arg12[%c0_42, %c0_43] : memref<128x4xf32, #tpu.memory_space<vmem>>, vector<128x4xf32>
    %cst_44 = arith.constant dense<0.000000e+00> : vector<96x4xf32>
    %61 = tpu.matmul %59, %60, %cst_44 {dimension_numbers = #tpu.dot_dimension_numbers<[1], [0], [0], [1], [0, 0, 1, 1], [], []>} : vector<96x128xf32>, vector<128x4xf32>, vector<96x4xf32> -> vector<96x4xf32>
    %62 = vector.shape_cast %61 : vector<96x4xf32> to vector<4x24x4xf32>
    %63 = vector.broadcast %52 : vector<4x24x1xf32> to vector<4x24x4xf32>
    %64 = arith.addf %62, %63 : vector<4x24x4xf32>
    %cst_45 = arith.constant dense<0xFF800000> : vector<4x4xf32>
    %65 = vector.multi_reduction <maximumf>, %64, %cst_45 [1] : vector<4x24x4xf32> to vector<4x4xf32>
    %66 = vector.shape_cast %65 : vector<4x4xf32> to vector<4x1x4xf32>
    %67 = vector.broadcast %66 : vector<4x1x4xf32> to vector<4x24x4xf32>
    %68 = arith.subf %64, %67 : vector<4x24x4xf32>
    %69 = math.exp %68 : vector<4x24x4xf32>
    %cst_46 = arith.constant dense<0.000000e+00> : vector<4x4xf32>
    %70 = vector.multi_reduction <add>, %69, %cst_46 [1] : vector<4x24x4xf32> to vector<4x4xf32>
    %71 = tpu.reciprocal %70 : vector<4x4xf32> -> vector<4x4xf32>
    %72 = vector.shape_cast %71 : vector<4x4xf32> to vector<4x1x4xf32>
    %73 = vector.broadcast %72 : vector<4x1x4xf32> to vector<4x24x4xf32>
    %74 = arith.mulf %69, %73 : vector<4x24x4xf32>
    %75 = vector.shape_cast %74 : vector<4x24x4xf32> to vector<96x4xf32>
    %c0_47 = arith.constant 0 : index
    %c0_48 = arith.constant 0 : index
    %76 = vector.load %arg13[%c0_47, %c0_48] : memref<4x128xf32, #tpu.memory_space<vmem>>, vector<4x128xf32>
    %cst_49 = arith.constant dense<0.000000e+00> : vector<96x128xf32>
    %77 = tpu.matmul %75, %76, %cst_49 {dimension_numbers = #tpu.dot_dimension_numbers<[1], [0], [0], [1], [0, 0, 1, 1], [], []>} : vector<96x4xf32>, vector<4x128xf32>, vector<96x128xf32> -> vector<96x128xf32>
    %78 = vector.shape_cast %77 : vector<96x128xf32> to vector<4x24x128xf32>
    %79 = arith.mulf %78, %1 : vector<4x24x128xf32>
    %cst_50 = arith.constant dense<0.000000e+00> : vector<4x128xf32>
    %80 = vector.multi_reduction <add>, %79, %cst_50 [1] : vector<4x24x128xf32> to vector<4x128xf32>
    %81 = arith.addf %50, %80 : vector<4x128xf32>
    %c0_51 = arith.constant 0 : index
    %c0_52 = arith.constant 0 : index
    %c0_53 = arith.constant 0 : index
    %82 = vector.load %arg14[%c0_51, %c0_52, %c0_53] : memref<1x4x128xf32, #tpu.memory_space<vmem>>, vector<1x4x128xf32>
    %83 = vector.shape_cast %82 : vector<1x4x128xf32> to vector<4x128xf32>
    %84 = vector.shape_cast %81 : vector<4x128xf32> to vector<1x4x128xf32>
    tpu.vector_store %arg14[%c0_51, %c0_52, %c0_53], %84 {strides = array<i32>} : memref<1x4x128xf32, #tpu.memory_space<vmem>>, vector<1x4x128xf32>,
    return
  }
  func.func @transform_0(%arg0: i32) -> (i32, i32, i32) {
    %c0_i32 = arith.constant 0 : i32
    %c0_i32_0 = arith.constant 0 : i32
    %c0_i32_1 = arith.constant 0 : i32
    return %arg0, %c0_i32, %c0_i32_0 : i32, i32, i32
  }
  func.func @transform_1(%arg0: i32) -> (i32, i32, i32) {
    %c0_i32 = arith.constant 0 : i32
    %c0_i32_0 = arith.constant 0 : i32
    %c0_i32_1 = arith.constant 0 : i32
    return %arg0, %c0_i32, %c0_i32_0 : i32, i32, i32
  }
  func.func @transform_2(%arg0: i32) -> (i32, i32, i32) {
    %c0_i32 = arith.constant 0 : i32
    %c0_i32_0 = arith.constant 0 : i32
    %c0_i32_1 = arith.constant 0 : i32
    return %arg0, %c0_i32, %c0_i32_0 : i32, i32, i32
  }
  func.func @transform_3(%arg0: i32) -> (i32, i32, i32) {
    %c0_i32 = arith.constant 0 : i32
    %c0_i32_0 = arith.constant 0 : i32
    %c0_i32_1 = arith.constant 0 : i32
    return %arg0, %c0_i32, %c0_i32_0 : i32, i32, i32
  }
  func.func @transform_4(%arg0: i32) -> (i32, i32) {
    %c0_i32 = arith.constant 0 : i32
    %c0_i32_0 = arith.constant 0 : i32
    %c0_i32_1 = arith.constant 0 : i32
    return %c0_i32, %c0_i32_0 : i32, i32
  }
  func.func @transform_5(%arg0: i32) -> (i32, i32) {
    %c0_i32 = arith.constant 0 : i32
    %c0_i32_0 = arith.constant 0 : i32
    %c0_i32_1 = arith.constant 0 : i32
    return %c0_i32, %c0_i32_0 : i32, i32
  }
  func.func @transform_6(%arg0: i32) -> (i32, i32) {
    %c0_i32 = arith.constant 0 : i32
    %c0_i32_0 = arith.constant 0 : i32
    %c0_i32_1 = arith.constant 0 : i32
    return %c0_i32, %c0_i32_0 : i32, i32
  }
  func.func @transform_7(%arg0: i32) -> (i32, i32) {
    %c0_i32 = arith.constant 0 : i32
    %c0_i32_0 = arith.constant 0 : i32
    %c0_i32_1 = arith.constant 0 : i32
    return %c0_i32, %c0_i32_0 : i32, i32
  }
  func.func @transform_8(%arg0: i32) -> (i32, i32) {
    %c0_i32 = arith.constant 0 : i32
    %c0_i32_0 = arith.constant 0 : i32
    %c0_i32_1 = arith.constant 0 : i32
    return %c0_i32, %c0_i32_0 : i32, i32
  }
  func.func @transform_9(%arg0: i32) -> (i32, i32) {
    %c0_i32 = arith.constant 0 : i32
    %c0_i32_0 = arith.constant 0 : i32
    %c0_i32_1 = arith.constant 0 : i32
    return %c0_i32, %c0_i32_0 : i32, i32
  }
  func.func @transform_10(%arg0: i32) -> (i32, i32) {
    %c0_i32 = arith.constant 0 : i32
    %c0_i32_0 = arith.constant 0 : i32
    %c0_i32_1 = arith.constant 0 : i32
    return %c0_i32, %c0_i32_0 : i32, i32
  }
  func.func @transform_11(%arg0: i32) -> (i32, i32) {
    %c0_i32 = arith.constant 0 : i32
    %c0_i32_0 = arith.constant 0 : i32
    %c0_i32_1 = arith.constant 0 : i32
    return %c0_i32, %c0_i32_0 : i32, i32
  }
  func.func @transform_12(%arg0: i32) -> (i32, i32) {
    %c0_i32 = arith.constant 0 : i32
    %c0_i32_0 = arith.constant 0 : i32
    %c0_i32_1 = arith.constant 0 : i32
    return %c0_i32, %c0_i32_0 : i32, i32
  }
  func.func @transform_13(%arg0: i32) -> (i32, i32, i32) {
    %c0_i32 = arith.constant 0 : i32
    %c0_i32_0 = arith.constant 0 : i32
    %c0_i32_1 = arith.constant 0 : i32
    return %arg0, %c0_i32, %c0_i32_0 : i32, i32, i32
  }
}

</mosaic_0001>

<bundles_post_ra>
// kernel: tpu_custom_call.1
= control target key start
LH: loop header
LB: loop body
LE: loop exit
PB: predicated region body
PF: predicated region fallthrough
CT: control target
= control target key end

     0   :  { %s4616_s0 = inlined_call_operand.hbm [shape: f32[8,16,128], index: 0, kind: input, shape index: {}]   ;;  %s4617_s1 = inlined_call_operand.vmem [shape: f32[8,24,128], index: 1, kind: input, shape index: {}]   ;;  %s4618_s2 = inlined_call_operand.vmem [shape: f32[8,16,1], index: 2, kind: input, shape index: {}]   ;;  %s4619_s3 = inlined_call_operand.vmem [shape: f32[8,24,1], index: 3, kind: input, shape index: {}]   ;;  %s4620_s4 = inlined_call_operand.hbm [shape: f32[128,128], index: 4, kind: input, shape index: {}]   ;;  %s4621_s5 = inlined_call_operand.vmem [shape: f32[1,128], index: 5, kind: input, shape index: {}]   ;;  %s4622_s6 = inlined_call_operand.hbm [shape: f32[128,128], index: 6, kind: input, shape index: {}]   ;;  %s4623_s7 = inlined_call_operand.vmem [shape: f32[1,128], index: 7, kind: input, shape index: {}]   ;;  %s4624_s8 = inlined_call_operand.vmem [shape: f32[256,128], index: 8, kind: input, shape index: {}]   ;;  %s4625_s9 = inlined_call_operand.hbm [shape: f32[128,128], index: 9, kind: input, shape index: {}]   ;;  %s4626_s10 = inlined_call_operand.hbm [shape: f32[128,128], index: 10, kind: input, shape index: {}]   ;;  %s4627_s11 = inlined_call_operand.vmem [shape: f32[128,4], index: 11, kind: input, shape index: {}]   ;;  %s4628_s12 = inlined_call_operand.vmem [shape: f32[4,128], index: 12, kind: input, shape index: {}]   ;;  %s4629_s13 = inlined_call_operand.hbm [shape: f32[2,4,128], index: 13, kind: output, shape index: {}]  }
   0x1   :  { %4636 = sst [smem:[#allocation18_spill]] %s4618_s2 }
   0x2   :  { %4637 = sst [smem:[#allocation19_spill]] %s4619_s3 }
   0x3   :  { %4638 = sst [smem:[#allocation20_spill]] %s4623_s7 }
   0x4   :  { %4639 = sst [smem:[#allocation21_spill]] %s4628_s12 }
   0x5   :  { %4640 = sst [smem:[#allocation22_spill]] %s4629_s13 }
   0x6   :  { %18 = vsyncpa [#allocation3], 0 }
   0x7   :  { %20 = vsyncpa [#allocation3 + $0x1], 0 }
   0x8   :  { %21 = vsyncpa [#allocation6], 0 }
   0x9   :  { %22 = vsyncpa [#allocation9], 0 }
   0xa   :  { %23 = vsyncpa [#allocation4], 0 }
   0xb   :  { %25 = vsyncpa [#allocation4 + $0x1], 0  ;;  %s3718_s25 = smov 0   ;;  %s3720_s26 = smov 0  }
   0xc   :  { %s3722_s27 = smov 0   ;;  %s3724_s28 = smov 0  }
   0xd LB: > { %4641 = sst [smem:[#allocation16_spill]] %s3621_s25  ;;  %s3739_s29 = sadd.s32 4294967295, %s3633_s28   ;;  %s3633_s28 = sphi %s3724_s28, %s4670_s28   ;;  %s3629_s27 = sphi %s3722_s27, %s4669_s27   ;;  %s3625_s26 = sphi %s3720_s26, %s4668_s26   ;;  %s3621_s25 = sphi %s3718_s25, %s4667_s25  }
   0xe   : > { %s2491_s30 = sadd.s32 4294967294, %s3633_s28   ;;  %p51_p0 = scmp.ne.s32.totalorder %s3625_s26, %s3621_s25 }
   0xf   : > { %p4633_p1 = scmp.eq.s32.totalorder %s3739_s29, 0  ;;  %p348_p3 = scmp.eq.s32.totalorder %s2491_s30, 1 }
  0x10   : > { %p2492_p5 = scmp.ge.s32.totalorder %s3633_s28, 1  ;;  %p355_p7 = scmp.lt.s32.totalorder %s3633_s28, 3 }
  0x11   : > { %p3748_p4 = por %p4633_p1, %p51_p0  ;;  %p3753_p6 = por %p348_p3, %p51_p0 }
  0x12   : > { %p3758_p8 = pnand %p2492_p5, %p355_p7  ;;  %s3635_s17 = smov [#allocation5]  }
  0x13   : > { %s4642_s14 = scalar_select %p3748_p4, 1, 0 }
  0x14   : > { %s4643_s15 = scalar_select %p3753_p6, 1, 0 }
  0x15   : > { %s4645_s16 = scalar_select %p3758_p8, 1, 0 }
  0x16   : > { %4644 = sst [smem:[#allocation17_spill]] %s4643_s15  ;;  %s367_s18 = sshll.u32 %s3635_s17, 4  ;;  %s3762_s18 = int_to_ptr.vmem [resolvable:$true] %s367_s18 }
  0x17   : > { %p3265_p9 = pneg %p3758_p8  ;;  %s3636_s20 = smov [#allocation8]  }
  0x18   : > { %s402_s21 = sshll.u32 %s3636_s20, 4  ;;  %s3637_s22 = smov [#allocation7]   ;;  %s3773_s21 = int_to_ptr.vmem [resolvable:$true] %s402_s21 }
  0x19   : > { %p3769_p11 = pnand %p3265_p9, %p4633_p1  ;;  %s3775_s23 = sshll.u32 %s3637_s22, 4  ;;  %s384_s23 = int_to_ptr.vmem [resolvable:$true] %s3775_s23 }
  0x1a   : > { %s3417_s17 = scalar_lea.hbm %s4620_s4, 2048 }
  0x1b   : > { %p3418_p12 = scmp.ne.s32.totalorder %s4620_s4, %s3417_s17  ;;  %p3785_p13 = pneg %p3769_p11 }
  0x1c   : > { %p3424_p5 = scmp.lt.u32.totalorder %s3417_s17, %s4620_s4 }
  0x1d   : > { %p3420_p0 = pnand %p3785_p13, %p3418_p12 }
  0x1f   : > { %p3421_p3 = pneg %p3420_p0 }
  0x21   : > { %p3426_p7 = pnand %p3424_p5, %p3421_p3 }
  0x23   : > { %3429 = shalt.err (!%p3426_p7)
}
  0x24   : > { %s3430_s25 = scalar_lea.vmem %s3762_s18, 2048  ;;  %p3438_p2 = scmp.lt.s32.totalorder %s3762_s18, %s3762_s18 }
  0x25   : > { %p3431_p9 = scmp.ne.s32.totalorder %s3762_s18, %s3430_s25  ;;  %p3439_p6 = scmp.lt.s32.totalorder %s3430_s25, %s3430_s25 }
  0x27   : > { %p3433_p10 = pnand %p3431_p9, %p3785_p13  ;;  %p3440_p12 = por %p3439_p6, %p3438_p2 }
  0x29   : > { %p3434_p1 = pneg %p3433_p10 }
  0x2b   : > { %p3441_p0 = pnand %p3440_p12, %p3434_p1 }
  0x2d   : > { %3444 = shalt.err (!%p3441_p0)
}
  0x2e   : > { %s3638_s15 = smov 128   ;;  %s3639_s24 = smov 8  }
  0x2f   : > { %3268 = dma.hbm_to_vmem [thread:$0]  (!%p3769_p11), %s4620_s4, 2048, %s3762_s18, [#allocation6], %s3638_s15, %s3638_s15, %s3639_s24  }
  0x30   : > { %s3445_s25 = scalar_lea.hbm %s4625_s9, 2048 }
  0x31   : > { %p3446_p1 = scmp.ne.s32.totalorder %s4625_s9, %s3445_s25  ;;  %p3452_p10 = scmp.lt.u32.totalorder %s3445_s25, %s4625_s9 }
  0x33   : > { %p3448_p2 = pnand %p3446_p1, %p3785_p13 }
  0x35   : > { %p3449_p6 = pneg %p3448_p2 }
  0x37   : > { %p3454_p3 = pnand %p3452_p10, %p3449_p6 }
  0x39   : > { %3457 = shalt.err (!%p3454_p3)
}
  0x3a   : > { %s3458_s18 = scalar_lea.vmem %s3773_s21, 2048  ;;  %p3466_p12 = scmp.lt.s32.totalorder %s3773_s21, %s3773_s21 }
  0x3b   : > { %p3459_p5 = scmp.ne.s32.totalorder %s3773_s21, %s3458_s18  ;;  %p3467_p0 = scmp.lt.s32.totalorder %s3458_s18, %s3458_s18 }
  0x3d   : > { %p3461_p7 = pnand %p3459_p5, %p3785_p13  ;;  %p3468_p1 = por %p3467_p0, %p3466_p12 }
  0x3f   : > { %p3462_p9 = pneg %p3461_p7 }
  0x41   : > { %p3469_p2 = pnand %p3468_p1, %p3462_p9 }
  0x43   : > { %3472 = shalt.err (!%p3469_p2)
}
  0x44   : > { %3274 = dma.hbm_to_vmem [thread:$0]  (!%p3769_p11), %s4625_s9, 2048, %s3773_s21, [#allocation9], %s3638_s15, %s3638_s15, %s3639_s24  }
  0x45   : > { %s3473_s30 = scalar_lea.hbm %s4622_s6, 2048 }
  0x46   : > { %p3474_p6 = scmp.ne.s32.totalorder %s4622_s6, %s3473_s30  ;;  %p3480_p5 = scmp.lt.u32.totalorder %s3473_s30, %s4622_s6 }
  0x48   : > { %p3476_p10 = pnand %p3474_p6, %p3785_p13 }
  0x4a   : > { %p3477_p3 = pneg %p3476_p10 }
  0x4c   : > { %p3482_p7 = pnand %p3480_p5, %p3477_p3 }
  0x4e   : > { %3485 = shalt.err (!%p3482_p7)
}
  0x4f   : > { %s3486_s18 = scalar_lea.vmem %s384_s23, 2048  ;;  %p3494_p1 = scmp.lt.s32.totalorder %s384_s23, %s384_s23 }
  0x50   : > { %p3487_p9 = scmp.ne.s32.totalorder %s384_s23, %s3486_s18  ;;  %p3495_p2 = scmp.lt.s32.totalorder %s3486_s18, %s3486_s18 }
  0x52   : > { %p3489_p12 = pnand %p3487_p9, %p3785_p13  ;;  %p3496_p4 = por %p3495_p2, %p3494_p1 }
  0x54   : > { %p3490_p0 = pneg %p3489_p12 }
  0x56   : > { %p3497_p8 = pnand %p3496_p4, %p3490_p0 }
  0x58   : > { %3500 = shalt.err (!%p3497_p8)
}
  0x59   : > { %3271 = dma.hbm_to_vmem [thread:$0]  (!%p3769_p11), %s4622_s6, 2048, %s384_s23, [#allocation6], %s3638_s15, %s3638_s15, %s3639_s24  }
  0x5a   : > { %s3640_s3 = smov [#allocation10]   ;;  %s3501_s17 = scalar_lea.hbm %s4626_s10, 2048 }
  0x5b   : > { %s415_s7 = sshll.u32 %s3640_s3, 4  ;;  %p3502_p4 = scmp.ne.s32.totalorder %s4626_s10, %s3501_s17  ;;  %s416_s7 = int_to_ptr.vmem [resolvable:$true] %s415_s7 }
  0x5c   : > { %p3508_p10 = scmp.lt.u32.totalorder %s3501_s17, %s4626_s10 }
  0x5d   : > { %p3504_p8 = pnand %p3502_p4, %p3785_p13 }
  0x5f   : > { %p3505_p6 = pneg %p3504_p8 }
  0x61   : > { %p3510_p3 = pnand %p3508_p10, %p3505_p6 }
  0x63   : > { %3513 = shalt.err (!%p3510_p3)
}
  0x64   : > { %s3514_s23 = scalar_lea.vmem %s416_s7, 2048  ;;  %p3522_p12 = scmp.lt.s32.totalorder %s416_s7, %s416_s7 }
  0x65   : > { %p3515_p5 = scmp.ne.s32.totalorder %s416_s7, %s3514_s23  ;;  %p3523_p0 = scmp.lt.s32.totalorder %s3514_s23, %s3514_s23 }
  0x67   : > { %p3517_p7 = pnand %p3515_p5, %p3785_p13  ;;  %p3524_p1 = por %p3523_p0, %p3522_p12 }
  0x69   : > { %p3518_p9 = pneg %p3517_p7 }
  0x6b   : > { %p3525_p2 = pnand %p3524_p1, %p3518_p9 }
  0x6d   : > { %3528 = shalt.err (!%p3525_p2)
}
  0x6e   : > { %3277 = dma.hbm_to_vmem [thread:$0]  (!%p3769_p11), %s4626_s10, 2048, %s416_s7, [#allocation9], %s3638_s15, %s3638_s15, %s3639_s24  }
  0x6f   : > { %s3879_s13 = sadd.s32 1, %s3633_s28   ;;  %s38_s19 = sadd.s32 1, %s3629_s27 }
  0x70   : > { %s35_s3 = ssub.s32 %s3633_s28, %s3879_s13  ;;  %p45_p13 = scmp.ne.s32.totalorder %s3629_s27, %s3625_s26 }
  0x71   : > { %p36_p4 = scmp.eq.s32.totalorder %s35_s3, 0  ;;  %p46_p8 = scmp.eq.s32.totalorder %s3633_s28, 0 }
  0x72   : > { %p4648_p6 = scmp.eq.s32.totalorder %s3739_s29, 1  ;;  %p3290_p3 = scmp.lt.s32.totalorder %s3633_s28, 2 }
  0x73   : > { %s3895_s30 = scalar_select %p36_p4, %s3629_s27, %s38_s19  }
  0x74   : > { %p3889_p10 = por %p4648_p6, %p45_p13  ;;  %p47_p5 = por %p46_p8, %p45_p13 }
  0x75   : > { %s435_s17 = sand.u32 1, %s3629_s27   ;;  %s2545_s7 = sshll.u32 %s3633_s28, 10 }
  0x76   : > { %s2498_s20 = sshll.u32 %s435_s17, 6  ;;  %s3902_s18 = scalar_lea.hbm %s4616_s0, %s2545_s7 }
  0x77   : > { %s439_s23 = scalar_lea.vmem [#allocation2], %s2498_s20  ;;  %p3906_p11 = pnand %p3290_p3, %p47_p5 }
  0x78   : > { %s447_s21 = sshll.u32 %s439_s23, 4  ;;  %s3910_s19 = scalar_lea.sflag [#allocation3], %s435_s17  ;;  %s3904_s21 = int_to_ptr.vmem [resolvable:$true] %s447_s21 }
  0x79   : > { %s3529_s3 = scalar_lea.hbm %s3902_s18, 1024  ;;  %p3531_p9 = pneg %p3906_p11 }
  0x7a   : > { %p3530_p7 = scmp.ne.s32.totalorder %s3902_s18, %s3529_s3  ;;  %s3534_s22 = scalar_lea.hbm %s4616_s0, 2048 }
  0x7b   : > { %p3535_p1 = scmp.lt.u32.totalorder %s3902_s18, %s4616_s0  ;;  %p3536_p2 = scmp.lt.u32.totalorder %s3534_s22, %s3529_s3 }
  0x7c   : > { %p3532_p12 = pnand %p3531_p9, %p3530_p7  ;;  %p3538_p4 = scmp.lt.u32.totalorder %s3529_s3, %s3902_s18 }
  0x7d   : > { %p3537_p13 = por %p3536_p2, %p3535_p1 }
  0x7e   : > { %p3533_p0 = pneg %p3532_p12 }
  0x7f   : > { %p3539_p8 = por %p3538_p4, %p3537_p13 }
  0x81   : > { %p3540_p6 = pnand %p3539_p8, %p3533_p0 }
  0x83   : > { %3543 = shalt.err (!%p3540_p6)
}
  0x84   : > { %s3544_s17 = scalar_lea.vmem %s3904_s21, 1024  ;;  %s3641_s20 = smov [#allocation2]  }
  0x85   : > { %p3545_p3 = scmp.ne.s32.totalorder %s3904_s21, %s3544_s17  ;;  %s3549_s7 = sshll.u32 %s3641_s20, 4  ;;  %s3550_s7 = int_to_ptr.vmem [resolvable:$false] %s3549_s7 }
  0x86   : > { %s3551_s25 = scalar_lea.vmem %s3550_s7, 2048  ;;  %p3552_p12 = scmp.lt.s32.totalorder %s3904_s21, %s3550_s7 }
  0x87   : > { %p3547_p5 = pnand %p3545_p3, %p3531_p9  ;;  %p3553_p1 = scmp.lt.s32.totalorder %s3551_s25, %s3544_s17 }
  0x89   : > { %p3548_p7 = pneg %p3547_p5  ;;  %p3554_p2 = por %p3553_p1, %p3552_p12 }
  0x8b   : > { %p3555_p13 = pnand %p3554_p2, %p3548_p7 }
  0x8d   : > { %3558 = shalt.err (!%p3555_p13)
}
  0x8e   : > { %3281 = dma.hbm_to_vmem [thread:$0]  (!%p3906_p11), %s3902_s18, 1024, %s3904_s21, %s3910_s19, %s3638_s15, %s3638_s15, %s3639_s24  }
  0x8f   : > { %p4651_p9 = scmp.ne.s32.totalorder %s4645_s16, 0 }
  0x90   : > { %s3944_s3 = sand.u32 (!%p4651_p9), 1, %s3625_s26   ;;  %p4652_p0 = scmp.ne.s32.totalorder (!%p4651_p9), %s4642_s14, 0 }
  0x91   : > { %489 = sbr.rel (%p4651_p9) target bundleno = 1712 (0x6b0), region = 72  ;;  %s2503_s22 = sshll.u32 (!%p4651_p9), %s3944_s3, 6 }
  0x92   : > { %s492_s23 = scalar_lea.sflag (!%p4651_p9), [#allocation3], %s3944_s3  ;;  %s3948_s17 = scalar_lea.vmem (!%p4651_p9), [#allocation2], %s2503_s22 }
  0x98   : > { %3604 = dma.done.wait (%p4652_p0), %s492_s23, 1024  }
  0x99   : > { %3606 = vsyncadd (%p4652_p0), %s492_s23, 4294966272  ;;  %p4653_p11 = scmp.eq.s32.totalorder %s3739_s29, 0 }
  0x9b   : > { %3608 = dma.done.wait (%p4653_p11), [#allocation6], 4096   ;;  %p4654_p4 = pmov %p4653_p11 }
  0x9d   : > { %3610 = vsyncadd (%p4654_p4), [#allocation6], 4294963200  ;;  %p4655_p8 = pmov %p4654_p4 }
  0x9e   : > { %p4656_p6 = pmov %p4654_p4 }
  0x9f   : > { %3612 = dma.done.wait (%p4655_p8), [#allocation9], 4096  }
  0xa0   : > { %3614 = vsyncadd (%p4656_p6), [#allocation9], 4294963200  ;;  %v3642_v0 = vmov 0.0|0.0   ;;  %vm3643_vm0 = vmmov 0   ;;  %v3644_v1 = vmov 0.0   ;;  %s2509_s14 = sshll.u32 %s3739_s29, 2 }
  0xa1   : > { %3034 = vmatprep.subr.bf16.mxu0 %v3642_v0  ;;  %3058 = vmatprep.subr.bf16.mxu1 %v3642_v0  ;;  %p574_p3 = scmp.lt.s32.totalorder %s2509_s14, 7  ;;  %v642_v2 = vld [vmem:[#allocation5] sm:$0xff]  ;;  %v643_v3 = vld [vmem:[#allocation5 + $0x8] sm:$0xff]  ;;  %v644_v7 = vld [vmem:[#allocation5 + $0x10] sm:$0xff]  ;;  %vm669_vm1 = vcmask 1041409   ;;  %vm671_vm2 = vcmask 1042434  }
  0xa2   : > { %2774 = vmatprep.mubr.msk.f32.mxu0 %vm3643_vm0, %v3644_v1  ;;  %2809 = vmatprep.mubr.msk.f32.mxu1 %vm3643_vm0, %v3644_v1  ;;  %v779_v4 = vld [vmem:[#allocation7] sm:$0xff]  ;;  %v3035_v5 = vpack.c.bf16 %v643_v3, %v642_v2  ;;  %v780_v6 = vld [vmem:[#allocation7 + $0x8] sm:$0xff]  ;;  %v645_v8 = vld [vmem:[#allocation5 + $0x18] sm:$0xff]  ;;  %vm673_vm3 = vcmask 1043459   ;;  %s4657_s19 = sld [smem:[#allocation20_spill]]  ;;  %s4658_s7 = sld [smem:[#allocation18_spill]] }
  0xa3   : > { %v3059_v9 = vpack.c.bf16 %v780_v6, %v779_v4  ;;  %v781_v10 = vld [vmem:[#allocation7 + $0x10] sm:$0xff]  ;;  %v782_v11 = vld [vmem:[#allocation7 + $0x18] sm:$0xff]  ;;  %s4672_s14 = smov (!%p574_p3, %s2509_s14), 7  ;;  %v3038_v12 = vpack.c.bf16 %v645_v8, %v644_v7  ;;  %v646_v14 = vld [vmem:[#allocation5 + $0x20] sm:$0xff]  ;;  %s4659_s15 = sld [smem:[#allocation19_spill]]  ;;  %vm1468_vm4 = vcmask 1043456  }
  0xa4   : > { %3036 = vmatpush3.bf16.msra.mxu0 %v3035_v5  ;;  %v3062_v13 = vpack.c.bf16 %v782_v11, %v781_v10  ;;  %v647_v15 = vld [vmem:[#allocation5 + $0x28] sm:$0xff]  ;;  %v783_v16 = vld [vmem:[#allocation7 + $0x20] sm:$0xff]  ;;  %v648_v18 = vld [vmem:[#allocation5 + $0x30] sm:$0xff]  ;;  %s3244_s16 = smul.u32 24, %s4672_s14  ;;  %s2546_s2 = sshll.u32 %s4672_s14, 4  ;;  %vm1334_vm5 = vcmask 31744  }
  0xa5   : > { %3060 = vmatpush3.bf16.msra.mxu1 %v3059_v9  ;;  %3037 = vmatprep.subr.bf16.mxu0 %v3642_v0  ;;  %v784_v17 = vld [vmem:[#allocation7 + $0x28] sm:$0xff]  ;;  %v649_v19 = vld [vmem:[#allocation5 + $0x38] sm:$0xff]  ;;  %v785_v20 = vld [vmem:[#allocation7 + $0x30] sm:$0xff]  ;;  %v3041_v21 = vpack.c.bf16 %v647_v15, %v646_v14  ;;  %s4660_s21 = sld [smem:[#allocation21_spill]] }
  0xa6   : > { %3061 = vmatprep.subr.bf16.mxu1 %v3642_v0  ;;  %v786_v22 = vld [vmem:[#allocation7 + $0x38] sm:$0xff]  ;;  %v3970_v23 = vld [vmem:[#allocation5 + $0x40] sm:$0xff]  ;;  %v3972_v24 = vld [vmem:[#allocation5 + $0x48] sm:$0xff]  ;;  %v3065_v25 = vpack.c.bf16 %v784_v17, %v783_v16  ;;  %s4004_s18 = scalar_lea.vmem %s4617_s1, %s3244_s16  ;;  %v3044_v37 = vpack.c.bf16 %v649_v19, %v648_v18 }
  0xa7   : > { %v3975_v26 = vld [vmem:[#allocation7 + $0x40] sm:$0xff]  ;;  %v3977_v27 = vld [vmem:[#allocation7 + $0x48] sm:$0xff]  ;;  %v3979_v28 = vld [vmem:[#allocation5 + $0x50] sm:$0xff]  ;;  %v3068_v38 = vpack.c.bf16 %v786_v22, %v785_v20  ;;  %v3047_v42 = vpack.c.bf16 %v3972_v24, %v3970_v23 }
  0xa8   : > { %3039 = vmatpush3.bf16.msra.mxu0 %v3038_v12  ;;  %v3982_v29 = vld [vmem:[#allocation5 + $0x58] sm:$0xff]  ;;  %v3984_v30 = vld [vmem:[#allocation7 + $0x50] sm:$0xff]  ;;  %v3988_v32 = vld [vmem:[#allocation5 + $0x60] sm:$0xff]  ;;  %v3071_v48 = vpack.c.bf16 %v3977_v27, %v3975_v26  ;;  %s585_s25 = scalar_lea.vmem %s4658_s7, %s2546_s2 }
  0xa9   : > { %3063 = vmatpush3.bf16.msra.mxu1 %v3062_v13  ;;  %3040 = vmatprep.subr.bf16.mxu0 %v3642_v0  ;;  %v3986_v31 = vld [vmem:[#allocation7 + $0x58] sm:$0xff]  ;;  %v3990_v33 = vld [vmem:[#allocation5 + $0x68] sm:$0xff]  ;;  %v3992_v34 = vld [vmem:[#allocation7 + $0x60] sm:$0xff]  ;;  %v3050_v49 = vpack.c.bf16 %v3982_v29, %v3979_v28  ;;  %s592_s24 = scalar_lea.vmem %s4659_s15, %s3244_s16  ;;  %s2334_s15 = scalar_lea.sflag [#allocation4], %s3944_s3 }
  0xaa   : > { %3064 = vmatprep.subr.bf16.mxu1 %v3642_v0  ;;  %v3994_v35 = vld [vmem:[#allocation7 + $0x68] sm:$0xff]  ;;  %v3997_v36 = vld [vmem:[%s3948_s17] sm:$0xff]  ;;  %v4010_v40 = vld [vmem:[%s3948_s17 + $0x10] sm:$0xff]  ;;  %v3074_v50 = vpack.c.bf16 %v3986_v31, %v3984_v30  ;;  %v3053_v62 = vpack.c.bf16 %v3990_v33, %v3988_v32 }
  0xab   : > { %v4007_v39 = vld [vmem:[%s3948_s17 + $0x8] sm:$0xff]  ;;  %v4013_v41 = vld [vmem:[%s3948_s17 + $0x18] sm:$0xff]  ;;  %v4019_v43 = vld [vmem:[%s3948_s17 + $0x20] sm:$0xff]  ;;  %v3077_v63 = vpack.c.bf16 %v3994_v35, %v3992_v34 }
  0xac   : > { %3042 = vmatpush3.bf16.msra.mxu0 %v3041_v21  ;;  %v4022_v44 = vld [vmem:[%s3948_s17 + $0x28] sm:$0xff]  ;;  %v4025_v45 = vld [vmem:[%s3948_s17 + $0x30] sm:$0xff]  ;;  %v614_v46 = vadd.f32 %v4007_v39, %v3997_v36  ;;  %v621_v47 = vadd.f32 %v4013_v41, %v4010_v40  ;;  %v4039_v51 = vld [vmem:[%s3948_s17 + $0x38] sm:$0xff] }
  0xad   : > { %3066 = vmatpush3.bf16.msra.mxu1 %v3065_v25  ;;  %3043 = vmatprep.subr.bf16.mxu0 %v3642_v0  ;;  %v628_v52 = vadd.f32 %v4022_v44, %v4019_v43  ;;  %v602_v53 = vld [vmem:[%s4004_s18] sm:$0xff]  ;;  %v603_v54 = vld [vmem:[%s4004_s18 + $0x8] sm:$0xff]  ;;  %v635_v57 = vadd.f32 %v4039_v51, %v4025_v45  ;;  %v604_v58 = vld [vmem:[%s4004_s18 + $0x10] sm:$0xff] }
  0xae   : > { %3067 = vmatprep.subr.bf16.mxu1 %v3642_v0  ;;  %v615_v55 = vrot.slane %v614_v46, 4  ;;  %v622_v56 = vrot.slane %v621_v47, 4  ;;  %v605_v59 = vld [vmem:[%s4004_s18 + $0x18] sm:$0xff]  ;;  %v606_v60 = vld [vmem:[%s4004_s18 + $0x20] sm:$0xff]  ;;  %v747_v61 = vadd.f32 %v603_v54, %v602_v53  ;;  %v607_v2 = vld [vmem:[%s4004_s18 + $0x28] sm:$0xff] }
  0xaf   : > { %v629_v1 = vrot.slane %v628_v52, 4  ;;  %v608_v3 = vld [vmem:[%s4004_s18 + $0x30] sm:$0xff]  ;;  %v609_v4 = vld [vmem:[%s4004_s18 + $0x38] sm:$0xff]  ;;  %v755_v5 = vadd.f32 %v606_v60, %v605_v59  ;;  %v636_v8 = vrot.slane %v635_v57, 4  ;;  %v610_v9 = vld [vmem:[%s4004_s18 + $0x40] sm:$0xff] }
  0xb0   : > { %3045 = vmatpush3.bf16.msra.mxu0 %v3044_v37  ;;  %v616_v6 = vadd.f32 %v615_v55, %v614_v46  ;;  %v623_v7 = vadd.f32 %v622_v56, %v621_v47  ;;  %v611_v10 = vld [vmem:[%s4004_s18 + $0x48] sm:$0xff]  ;;  %v612_v11 = vld [vmem:[%s4004_s18 + $0x50] sm:$0xff]  ;;  %v748_v12 = vadd.f32 %v747_v61, %v604_v58  ;;  %v613_v14 = vld [vmem:[%s4004_s18 + $0x58] sm:$0xff]  ;;  %v763_v16 = vadd.f32 %v609_v4, %v608_v3 }
  0xb1   : > { %3069 = vmatpush3.bf16.msra.mxu1 %v3068_v38  ;;  %3046 = vmatprep.subr.bf16.mxu0 %v3642_v0  ;;  %v630_v13 = vadd.f32 %v629_v1, %v628_v52  ;;  %v756_v15 = vadd.f32 %v755_v5, %v607_v2  ;;  %v771_v17 = vadd.f32 %v612_v11, %v611_v10  ;;  %v656_v55 = vld [vmem:[#allocation5 + $0x70] sm:$0xff]  ;;  %v657_v56 = vld [vmem:[#allocation5 + $0x78] sm:$0xff]  ;;  %v898_v30 = vld [vmem:[%s4624_s8 + $0x88] sm:$0xff] }
  0xb2   : > { %3070 = vmatprep.subr.bf16.mxu1 %v3642_v0  ;;  %v617_v18 = vrot.slane %v616_v6, 2  ;;  %v624_v19 = vrot.slane %v623_v7, 2  ;;  %v637_v20 = vadd.f32 %v636_v8, %v635_v57  ;;  %v749_v21 = vrot.slane %v748_v12, 4  ;;  %v793_v60 = vld [vmem:[#allocation7 + $0x70] sm:$0xff]  ;;  %v897_v8 = vld [vmem:[%s4624_s8 + $0x80] sm:$0xff]  ;;  %v882_v32 = vld [vmem:[%s4624_s8 + $0x8] sm:$0xff] }
  0xb3   : > { %v631_v22 = vrot.slane %v630_v13, 2  ;;  %v757_v23 = vrot.slane %v756_v15, 4  ;;  %v764_v24 = vadd.f32 %v763_v16, %v610_v9  ;;  %v772_v25 = vadd.f32 %v771_v17, %v613_v14  ;;  %v983_v11 = vld [vmem:[#allocation8] sm:$0xff]  ;;  %v899_v35 = vld [vmem:[%s4624_s8 + $0x90] sm:$0xff] }
  0xb4   : > { %3048 = vmatpush3.bf16.msra.mxu0 %v3047_v42  ;;  %v618_v26 = vadd.f32 %v617_v18, %v616_v6  ;;  %v625_v27 = vadd.f32 %v624_v19, %v623_v7  ;;  %v638_v28 = vrot.slane %v637_v20, 2  ;;  %v750_v29 = vadd.f32 %v749_v21, %v748_v12  ;;  %v984_v12 = vld [vmem:[#allocation8 + $0x8] sm:$0xff] }
  0xb5   : > { %3072 = vmatpush3.bf16.msra.mxu1 %v3071_v48  ;;  %3049 = vmatprep.subr.bf16.mxu0 %v3642_v0  ;;  %v632_v37 = vadd.f32 %v631_v22, %v630_v13  ;;  %v758_v38 = vadd.f32 %v757_v23, %v756_v15  ;;  %v765_v46 = vrot.slane %v764_v24, 4  ;;  %v773_v47 = vrot.slane %v772_v25, 4  ;;  %v985_v23 = vld [vmem:[#allocation8 + $0x10] sm:$0xff] }
  0xb6   : > { %3073 = vmatprep.subr.bf16.mxu1 %v3642_v0  ;;  %v619_v52 = vrot.slane %v618_v26, 1  ;;  %v626_v42 = vrot.slane %v625_v27, 1  ;;  %v639_v53 = vadd.f32 %v638_v28, %v637_v20  ;;  %v751_v54 = vrot.slane %v750_v29, 2  ;;  %v881_v20 = vld [vmem:[%s4624_s8] sm:$0xff] }
  0xb7   : > { %v633_v48 = vrot.slane %v632_v37, 1  ;;  %v759_v57 = vrot.slane %v758_v38, 2  ;;  %v766_v58 = vadd.f32 %v765_v46, %v764_v24  ;;  %v774_v59 = vadd.f32 %v773_v47, %v772_v25  ;;  %v986_v24 = vld [vmem:[#allocation8 + $0x18] sm:$0xff]  ;;  %v901_v47 = vld [vmem:[%s4624_s8 + $0xa0] sm:$0xff] }
  0xb8   : > { %3051 = vmatpush3.bf16.msra.mxu0 %v3050_v49  ;;  %v620_v61 = vadd.f32 %v619_v52, %v618_v26  ;;  %v627_v1 = vadd.f32 %v626_v42, %v625_v27  ;;  %v640_v2 = vrot.slane %v639_v53, 1  ;;  %v752_v3 = vadd.f32 %v751_v54, %v750_v29  ;;  %v794_v49 = vld [vmem:[#allocation7 + $0x78] sm:$0xff]  ;;  %v883_v29 = vld [vmem:[%s4624_s8 + $0x10] sm:$0xff]  ;;  %v902_v52 = vld [vmem:[%s4624_s8 + $0xa8] sm:$0xff] }
  0xb9   : > { %3075 = vmatpush3.bf16.msra.mxu1 %v3074_v50  ;;  %3052 = vmatprep.subr.bf16.mxu0 %v3642_v0  ;;  %v634_v4 = vadd.f32 %v633_v48, %v632_v37  ;;  %v760_v5 = vadd.f32 %v759_v57, %v758_v38  ;;  %v767_v6 = vrot.slane %v766_v58, 2  ;;  %v775_v7 = vrot.slane %v774_v59, 2  ;;  %v884_v37 = vld [vmem:[%s4624_s8 + $0x18] sm:$0xff]  ;;  %v988_v54 = vld [vmem:[#allocation8 + $0x28] sm:$0xff]  ;;  %v885_v48 = vld [vmem:[%s4624_s8 + $0x20] sm:$0xff] }
  0xba   : > { %3076 = vmatprep.subr.bf16.mxu1 %v3642_v0  ;;  %v3056_v31 = vpack.c.bf16 %v657_v56, %v656_v55  ;;  %v641_v50 = vadd.f32 %v640_v2, %v639_v53  ;;  %v670_v9 = vsel %vm669_vm1, %v627_v1, %v620_v61  ;;  %v753_v10 = vrot.slane %v752_v3, 1  ;;  %v987_v53 = vld [vmem:[#allocation8 + $0x20] sm:$0xff]  ;;  %v886_v57 = vld [vmem:[%s4624_s8 + $0x28] sm:$0xff]  ;;  %v989_v61 = vld [vmem:[#allocation8 + $0x30] sm:$0xff] }
  0xbb   : > { %v672_v13 = vsel %vm671_vm2, %v634_v4, %v670_v9  ;;  %v761_v14 = vrot.slane %v760_v5, 1  ;;  %v768_v15 = vadd.f32 %v767_v6, %v766_v58  ;;  %v776_v16 = vadd.f32 %v775_v7, %v774_v59  ;;  %v903_v59 = vld [vmem:[%s4624_s8 + $0xb0] sm:$0xff]  ;;  %v990_v1 = vld [vmem:[#allocation8 + $0x38] sm:$0xff]  ;;  %v906_v6 = vld [vmem:[%s4624_s8 + $0xc8] sm:$0xff] }
  0xbc   : > { %3054 = vmatpush3.bf16.msra.mxu0 %v3053_v62  ;;  %v3080_v17 = vpack.c.bf16 %v794_v49, %v793_v60  ;;  %v754_v18 = vadd.f32 %v753_v10, %v752_v3  ;;  %v3082_v19 = vpack.c.bf16 %v898_v30, %v897_v8  ;;  %v3114_v34 = vpack.c.bf16 %v984_v12, %v983_v11  ;;  %v904_v60 = vld [vmem:[%s4624_s8 + $0xb8] sm:$0xff]  ;;  %v887_v49 = vld [vmem:[%s4624_s8 + $0x30] sm:$0xff]  ;;  %v991_v7 = vld [vmem:[#allocation8 + $0x40] sm:$0xff] }
  0xbd   : > { %3078 = vmatpush3.bf16.msra.mxu1 %v3077_v63  ;;  %3055 = vmatprep.subr.bf16.mxu0 %v3642_v0  ;;  %v762_v33 = vadd.f32 %v761_v14, %v760_v5  ;;  %v769_v62 = vrot.slane %v768_v15, 1  ;;  %v777_v21 = vrot.slane %v776_v16, 1  ;;  %v900_v63 = vld [vmem:[%s4624_s8 + $0x98] sm:$0xff]  ;;  %v674_v22 = vsel %vm673_vm3, %v641_v50, %v672_v13  ;;  %v992_v8 = vld [vmem:[#allocation8 + $0x48] sm:$0xff]  ;;  %v889_v50 = vld [vmem:[%s4624_s8 + $0x40] sm:$0xff] }
  0xbe   : > { %3079 = vmatprep.subr.bf16.mxu1 %v3642_v0  ;;  %v3084_v27 = vpack.c.bf16 %v882_v32, %v881_v20  ;;  %v3086_v28 = vpack.c.bf16 %v900_v63, %v899_v35  ;;  %v3118_v46 = vpack.c.bf16 %v986_v24, %v985_v23  ;;  %v3088_v55 = vpack.c.bf16 %v884_v37, %v883_v29  ;;  %v888_v4 = vld [vmem:[%s4624_s8 + $0x38] sm:$0xff]  ;;  %v890_v9 = vld [vmem:[%s4624_s8 + $0x48] sm:$0xff]  ;;  %v907_v11 = vld [vmem:[%s4624_s8 + $0xd0] sm:$0xff] }
  0xbf   : > { %v770_v25 = vadd.f32 %v769_v62, %v768_v15  ;;  %v778_v26 = vadd.f32 %v777_v21, %v776_v16  ;;  %v806_v0 = vsel %vm669_vm1, %v762_v33, %v754_v18  ;;  %v3090_v56 = vpack.c.bf16 %v902_v52, %v901_v47  ;;  %v908_v12 = vld [vmem:[%s4624_s8 + $0xd8] sm:$0xff]  ;;  %v993_v13 = vld [vmem:[#allocation8 + $0x50] sm:$0xff]  ;;  %v909_v20 = vld [vmem:[%s4624_s8 + $0xe0] sm:$0xff] }
  0xc0   : > { %3057 = vmatpush3.bf16.msra.mxu0 %v3056_v31  ;;  %v3122_v58 = vpack.c.bf16 %v988_v54, %v987_v53  ;;  %v3092_v2 = vpack.c.bf16 %v886_v57, %v885_v48  ;;  %v3094_v3 = vpack.c.bf16 %v904_v60, %v903_v59  ;;  %v3126_v5 = vpack.c.bf16 %v990_v1, %v989_v61  ;;  %v994_v14 = vld [vmem:[#allocation8 + $0x58] sm:$0xff]  ;;  %v910_v32 = vld [vmem:[%s4624_s8 + $0xe8] sm:$0xff]  ;;  %v995_v33 = vld [vmem:[#allocation8 + $0x60] sm:$0xff] }
  0xc1   : > { %3081 = vmatpush3.bf16.msra.mxu1 %v3080_v17  ;;  %3083 = vmatprep.subr.bf16.mxu0 %v3082_v19  ;;  %v807_v38 = vsel %vm671_vm2, %v770_v25, %v806_v0  ;;  %v3096_v30 = vpack.c.bf16 %v888_v4, %v887_v49  ;;  %v3130_v10 = vpack.c.bf16 %v992_v8, %v991_v7  ;;  %v891_v17 = vld [vmem:[%s4624_s8 + $0x50] sm:$0xff]  ;;  %v892_v18 = vld [vmem:[%s4624_s8 + $0x58] sm:$0xff]  ;;  %v996_v62 = vld [vmem:[#allocation8 + $0x68] sm:$0xff] }
  0xc2   : > { %3115 = vmatprep.subr.bf16.mxu1 %v3114_v34  ;;  %v808_v42 = vsel %vm673_vm3, %v778_v26, %v807_v38  ;;  %v3100_v15 = vpack.c.bf16 %v890_v9, %v889_v50  ;;  %v3102_v16 = vpack.c.bf16 %v908_v12, %v907_v11  ;;  %v3134_v19 = vpack.c.bf16 %v994_v14, %v993_v13  ;;  %v893_v35 = vld [vmem:[%s4624_s8 + $0x60] sm:$0xff]  ;;  %v894_v63 = vld [vmem:[%s4624_s8 + $0x68] sm:$0xff]  ;;  %v911_v24 = vld [vmem:[%s4624_s8 + $0xf0] sm:$0xff] }
  0xc3   : > { %2775 = vmatmul.mubr.f32.vlgmr.msra.gmra.mrb[0].mxu0 %v674_v22  ;;  %v3104_v21 = vpack.c.bf16 %v892_v18, %v891_v17  ;;  %v3138_v22 = vpack.c.bf16 %v996_v62, %v995_v33  ;;  %v3108_v23 = vpack.c.bf16 %v894_v63, %v893_v35  ;;  %v912_v25 = vld [vmem:[%s4624_s8 + $0xf8] sm:$0xff]  ;;  %v997_v26 = vld [vmem:[#allocation8 + $0x70] sm:$0xff]  ;;  %v1166_v47 = vld [vmem:[%s4627_s11 + $0x8] sm:$0xff]  ;;  %v3645_v17 = vmov 0  }
  0xc4   : > { %2810 = vmatmul.mubr.f32.vlgmr.msra.gmra.mrb[0].mxu1 %v808_v42  ;;  %3085 = vmatpush3.bf16.msra.mxu0 %v3084_v27  ;;  %v3110_v0 = vpack.c.bf16 %v912_v25, %v911_v24  ;;  %v998_v27 = vld [vmem:[#allocation8 + $0x78] sm:$0xff]  ;;  %v1169_v57 = vld [vmem:[%s4627_s11 + $0x20] sm:$0xff]  ;;  %v1171_v60 = vld [vmem:[%s4627_s11 + $0x30] sm:$0xff] }
  0xc5   : > { %3117 = vmatpush3.bf16.msra.mxu1 %v3114_v34  ;;  %3087 = vmatprep.subr.bf16.mxu0 %v3086_v28  ;;  %v3106_v34 = vpack.c.bf16 %v910_v32, %v909_v20  ;;  %v895_v28 = vld [vmem:[%s4624_s8 + $0x70] sm:$0xff]  ;;  %v3142_v29 = vpack.c.bf16 %v998_v27, %v997_v26  ;;  %v896_v37 = vld [vmem:[%s4624_s8 + $0x78] sm:$0xff]  ;;  %v1178_v7 = vld [vmem:[%s4627_s11 + $0x68] sm:$0xff] }
  0xc6   : > { %3119 = vmatprep.subr.bf16.mxu1 %v3118_v46  ;;  %2844 = vmatprep.mubr.f32.mxu1 %v3997_v36  ;;  %v905_v36 = vld [vmem:[%s4624_s8 + $0xc0] sm:$0xff]  ;;  %v3112_v38 = vpack.c.bf16 %v896_v37, %v895_v28  ;;  %v1172_v61 = vld [vmem:[%s4627_s11 + $0x38] sm:$0xff]  ;;  %v1175_v4 = vld [vmem:[%s4627_s11 + $0x50] sm:$0xff] }
  0xc7   : > { %v3098_v31 = vpack.c.bf16 %v906_v6, %v905_v36  ;;  %v4229_v1 = vpack.c.bf16 %v1172_v61, %v1171_v60  ;;  %v1177_v6 = vld [vmem:[%s4627_s11 + $0x60] sm:$0xff]  ;;  %v1179_v50 = vld [vmem:[%s4627_s11 + $0x70] sm:$0xff]  ;;  %v1180_v9 = vld [vmem:[%s4627_s11 + $0x78] sm:$0xff]  ;;  %3339 = vset.pattern.permute.xlu0 %v3645_v17  ;;  %3340 = vset.pattern.permute.xlu1 %v3645_v17 }
  0xc8   : > { %3089 = vmatpush3.bf16.msra.mxu0 %v3088_v55  ;;  %v4260_v8 = vpack.c.bf16 %v1178_v7, %v1177_v6  ;;  %v999_v18 = vld [vmem:[%s585_s25] sm:$0xff]  ;;  %v1000_v20 = vld [vmem:[%s585_s25 + $0x8] sm:$0xff]  ;;  %v1002_v32 = vld [vmem:[%s585_s25 + $0x18] sm:$0xff] }
  0xc9   : > { %3121 = vmatpush3.bf16.msra.mxu1 %v3118_v46  ;;  %3091 = vmatprep.subr.bf16.mxu0 %v3090_v56  ;;  %v1165_v46 = vld [vmem:[%s4627_s11] sm:$0xff]  ;;  %v1004_v62 = vld [vmem:[%s585_s25 + $0x28] sm:$0xff]  ;;  %v1631_v24 = vld [vmem:[%s592_s24 + $0x10] sm:$0xff] }
  0xca   : > { %3123 = vmatprep.subr.bf16.mxu1 %v3122_v58  ;;  %v4188_v52 = vpack.c.bf16 %v1166_v47, %v1165_v46  ;;  %1288 = vperm.xlu0 %3339, %v999_v18   ;;  %v1003_v33 = vld [vmem:[%s585_s25 + $0x20] sm:$0xff]  ;;  %v1630_v63 = vld [vmem:[%s592_s24 + $0x8] sm:$0xff]  ;;  %v1635_v26 = vld [vmem:[%s592_s24 + $0x30] sm:$0xff]  ;;  %v1116_v47 = vlaneseq }
  0xcb   : > { %v1629_v35 = vld [vmem:[%s592_s24] sm:$0xff]  ;;  %v1634_v25 = vld [vmem:[%s592_s24 + $0x28] sm:$0xff]  ;;  %v1640_v37 = vld [vmem:[%s592_s24 + $0x58] sm:$0xff] }
  0xcc   : > { %3093 = vmatpush3.bf16.msra.mxu0 %v3092_v2  ;;  %v1173_v2 = vld [vmem:[%s4627_s11 + $0x40] sm:$0xff]  ;;  %v1638_v28 = vld [vmem:[%s592_s24 + $0x48] sm:$0xff] }
  0xcd   : > { %3125 = vmatpush3.bf16.msra.mxu1 %v3122_v58  ;;  %3095 = vmatprep.subr.bf16.mxu0 %v3094_v3  ;;  %v1170_v58 = vld [vmem:[%s4627_s11 + $0x28] sm:$0xff]  ;;  %v1637_v27 = vld [vmem:[%s592_s24 + $0x40] sm:$0xff] }
  0xce   : > { %3127 = vmatprep.subr.bf16.mxu1 %v3126_v5  ;;  %v4219_v59 = vpack.c.bf16 %v1170_v58, %v1169_v57  ;;  %v1174_v3 = vld [vmem:[%s4627_s11 + $0x48] sm:$0xff]  ;;  %1293 = vperm.xlu0 %3339, %v1000_v20  }
  0xcf   : > { %v4239_v49 = vpack.c.bf16 %v1174_v3, %v1173_v2 }
  0xd0   : > { %3097 = vmatpush3.bf16.msra.mxu0 %v3096_v30 }
  0xd1   : > { %3129 = vmatpush3.bf16.msra.mxu1 %v3126_v5  ;;  %3099 = vmatprep.subr.bf16.mxu0 %v3098_v31  ;;  %v1176_v5 = vld [vmem:[%s4627_s11 + $0x58] sm:$0xff] }
  0xd2   : > { %3131 = vmatprep.subr.bf16.mxu1 %v3130_v10  ;;  %v4250_v36 = vpack.c.bf16 %v1176_v5, %v1175_v4  ;;  %1308 = vperm.xlu0 %3339, %v1003_v33  }
  0xd4   : > { %3101 = vmatpush3.bf16.msra.mxu0 %v3100_v15 }
  0xd5   : > { %3133 = vmatpush3.bf16.msra.mxu1 %v3130_v10  ;;  %3103 = vmatprep.subr.bf16.mxu0 %v3102_v16  ;;  %v4274_v10 = vpack.c.bf16 %v1180_v9, %v1179_v50 }
  0xd6   : > { %3135 = vmatprep.subr.bf16.mxu1 %v3134_v19 }
  0xd8   : > { %3105 = vmatpush3.bf16.msra.mxu0 %v3104_v21  ;;  %v1005_v21 = vld [vmem:[%s585_s25 + $0x30] sm:$0xff] }
  0xd9   : > { %3137 = vmatpush3.bf16.msra.mxu1 %v3134_v19  ;;  %3107 = vmatprep.subr.bf16.mxu0 %v3106_v34  ;;  %v1001_v19 = vld [vmem:[%s585_s25 + $0x10] sm:$0xff]  ;;  %v1006_v34 = vld [vmem:[%s585_s25 + $0x38] sm:$0xff]  ;;  %s4661_s25 = sld [smem:[#allocation22_spill]] }
  0xda   : > { %3139 = vmatprep.subr.bf16.mxu1 %v3138_v22  ;;  %1298 = vperm.xlu1 %3340, %v1001_v19  }
  0xdb   : > { %1318 = vperm.xlu0 %3339, %v1005_v21  }
  0xdc   : > { %3109 = vmatpush3.bf16.msra.mxu0 %v3108_v23  ;;  %v1633_v23 = vld [vmem:[%s592_s24 + $0x20] sm:$0xff] }
  0xdd   : > { %3141 = vmatpush3.bf16.msra.mxu1 %v3138_v22  ;;  %3111 = vmatprep.subr.bf16.mxu0 %v3110_v0  ;;  %v1632_v22 = vld [vmem:[%s592_s24 + $0x18] sm:$0xff] }
  0xde   : > { %3143 = vmatprep.subr.bf16.mxu1 %v3142_v29  ;;  %1303 = vperm.xlu1 %3340, %v1002_v32   ;;  %v1636_v0 = vld [vmem:[%s592_s24 + $0x38] sm:$0xff] }
  0xdf   : > { %1905 = vperm.xlu0 %3339, %v1629_v35   ;;  %s4662_s22 = smov %s4661_s25 }
  0xe0   : > { %3113 = vmatpush3.bf16.msra.mxu0 %v3112_v38  ;;  %v3646_v38 = vmov 1966171168  }
  0xe1   : > { %3145 = vmatpush3.bf16.msra.mxu1 %v3142_v29  ;;  %3147 = vmatprep.subr.bf16.mxu0 %v4188_v52  ;;  %v1639_v29 = vld [vmem:[%s592_s24 + $0x50] sm:$0xff]  ;;  %v1114_v46 = vunpack.c.l.s4 %v3646_v38 }
  0xe2   : > { %1313 = vperm.xlu1 %3340, %v1004_v62  }
  0xe3   : > { %1920 = vperm.xlu0 %3339, %v1632_v22  }
  0xe4   : > { %2845 = vmatmul.mubr.f32.vlgmr.msra.gmra.mrb[2].mxu1 %v4007_v39  ;;  %v2516_v39 = vld [vmem:[%s4621_s5] ss:$0 sm:$0xff] }
  0xe5   : > { %2847 = vmatprep.mubr.f32.mxu1 %v4010_v40  ;;  %v2517_v40 = vld [vmem:[%s4657_s19] ss:$0 sm:$0xff] }
  0xe6   : > { %1323 = vperm.xlu1 %3340, %v1006_v34  }
  0xe7   : > { %1915 = vperm.xlu0 %3339, %v1631_v24  }
  0xe8   : > { %2848 = vmatmul.mubr.f32.gmra.mrb[4].mxu1 %v4013_v41 }
  0xe9   : > { %2850 = vmatprep.mubr.f32.mxu1 %v4019_v43 }
  0xea   : > { %1910 = vperm.xlu1 %3340, %v1630_v63  }
  0xeb   : > { %1935 = vperm.xlu0 %3339, %v1635_v26  }
  0xec   : > { %2851 = vmatmul.mubr.f32.gmra.mrb[6].mxu1 %v4022_v44  ;;  %v1167_v44 = vld [vmem:[%s4627_s11 + $0x10] sm:$0xff] }
  0xed   : > { %2853 = vmatprep.mubr.f32.mxu1 %v4025_v45  ;;  %v1168_v45 = vld [vmem:[%s4627_s11 + $0x18] sm:$0xff] }
  0xee   : > { %v4209_v48 = vpack.c.bf16 %v1168_v45, %v1167_v44  ;;  %1925 = vperm.xlu1 %3340, %v1633_v23  }
  0xef   : > { %1945 = vperm.xlu0 %3339, %v1637_v27  }
  0xf0   : > { %2854 = vmatmul.mubr.f32.gmra.mrb[8].mxu1 %v4039_v51 }
  0xf2   : > { %1930 = vperm.xlu1 %3340, %v1634_v25  }
  0xf3   : > { %1955 = vperm.xlu0 %3339, %v1639_v29  }
  0xf6   : > { %1940 = vperm.xlu1 %3340, %v1636_v0  }
  0xfa   : > { %1950 = vperm.xlu1 %3340, %v1638_v28  }
  0xfe   : > { %1960 = vperm.xlu1 %3340, %v1640_v37  }
 0x196   : > { %v742_v42 = vpop.f32.mrb[0].mxu0 }
 0x197   : > { %v743_v53 = vadd.f32 %v2516_v39, %v742_v42  ;;  %v876_v54 = vpop.f32.mrb[0].mxu1  ;;  %v2776_v41 = vpop.f32.mrb[1].mxu0  ;;  %v1115_v39 = vunpack.c.0.s8 %v1114_v46 }
 0x198   : > { %v877_v55 = vadd.f32 %v2517_v40, %v876_v54  ;;  %v2811_v43 = vpop.f32.mrb[1].mxu1  ;;  %v1117_v40 = vshrl.u32 %v1116_v47, 7 }
 0x199   : > { %v746_v51 = vmax.f32 %v743_v53, 0.0 }
 0x19a   : > { %v880_v56 = vmax.f32 %v877_v55, 0.0  ;;  %v1118_v53 = vsub.s32 %v1115_v39, %v1117_v40  ;;  %v1139_v43 = vsub.s32 0, %v1117_v40 }
 0x19c   : > { %977 = vmatprep.mubr.f32.mxu0 %v880_v56 }
 0x19d   : > { %978 = vmatmul.mubr.f32.vlgmr.msra.gmra.mrb[2].mxu0 %v746_v51 }
 0x19e   : > { %3149 = vmatpush3.bf16.msra.mxu0 %v4188_v52 }
 0x19f   : > { %3151 = vmatprep.subr.bf16.mxu0 %v4209_v48 }
 0x1a2   : > { %3153 = vmatpush3.bf16.msra.mxu0 %v4209_v48 }
 0x1a3   : > { %3155 = vmatprep.subr.bf16.mxu0 %v4219_v59 }
 0x1a6   : > { %3157 = vmatpush3.bf16.msra.mxu0 %v4219_v59 }
 0x1a7   : > { %3159 = vmatprep.subr.bf16.mxu0 %v4229_v1 }
 0x1aa   : > { %3161 = vmatpush3.bf16.msra.mxu0 %v4229_v1 }
 0x1ab   : > { %3163 = vmatprep.subr.bf16.mxu0 %v4239_v49 }
 0x1ae   : > { %3165 = vmatpush3.bf16.msra.mxu0 %v4239_v49 }
 0x1af   : > { %3167 = vmatprep.subr.bf16.mxu0 %v4250_v36 }
 0x1b2   : > { %3169 = vmatpush3.bf16.msra.mxu0 %v4250_v36 }
 0x1b3   : > { %3171 = vmatprep.subr.bf16.mxu0 %v4260_v8 }
 0x1b6   : > { %3173 = vmatpush3.bf16.msra.mxu0 %v4260_v8 }
 0x1b7   : > { %v4263_v30 = vpop.f32.mrb[2].mxu1  ;;  %3175 = vmatprep.subr.bf16.mxu0 %v4274_v10 }
 0x1b8   : > { %v4266_v31 = vpop.f32.mrb[3].mxu1 }
 0x1ba   : > { %3177 = vmatpush3.bf16.msra.mxu0 %v4274_v10 }
 0x1bb   : > { %v4276_v11 = vpop.f32.mrb[4].mxu1  ;;  %3211 = vmatprep.subr.bf16.mxu0 %v4188_v52 }
 0x1bc   : > { %v4278_v12 = vpop.f32.mrb[5].mxu1 }
 0x1bf   : > { %v4281_v13 = vpop.f32.mrb[6].mxu1 }
 0x1c0   : > { %v4284_v14 = vpop.f32.mrb[7].mxu1 }
 0x1c3   : > { %v4287_v15 = vpop.f32.mrb[8].mxu1 }
 0x1c4   : > { %v4289_v16 = vpop.f32.mrb[9].mxu1 }
 0x270   : > { %v2613_v42 = vpop.f32.mrb[2].mxu0 }
 0x271   : > { %v2614_v54 = vpop.f32.mrb[3].mxu0 }
 0x272   : > { %v2615_v41 = vadd.f32 %v2614_v54, %v2613_v42 }
 0x274   : > { %v1119_v55 = vrot.slane %v2615_v41, %v1118_v53 }
 0x276   : > { %v1120_v44 = vcombine.high %v1119_v55, %v1119_v55  ;;  %v1127_v45 = vrot.slane %v1119_v55, %v1118_v53 }
 0x278   : > { %v1134_v51 = vrot.slane %v1120_v44, %v1118_v53  ;;  %v4300_v56 = vrot.slane %v1127_v45, %v1139_v43  ;;  %v1135_v57 = vcombine.high %v1127_v45, %v1127_v45 }
 0x27a   : > { %v4302_v58 = vrot.slane %v1134_v51, %v1139_v43  ;;  %v1158_v60 = vmul.f32 %v4263_v30, %v4300_v56  ;;  %v1157_v61 = vmul.f32 %v4300_v56, %v4266_v31  ;;  %v1136_v3 = vcombine.high %v1134_v51, %v1134_v51 }
 0x27b   : > { %v4310_v4 = vrot.slane %v1135_v57, %v1139_v43 }
 0x27c   : > { %v1159_v2 = vmul.f32 %v4302_v58, %v4278_v12  ;;  %2888 = vmatprep.mubr.f32.mxu0 %v1157_v61  ;;  %v1160_v5 = vmul.f32 %v4276_v11, %v4302_v58  ;;  %v4316_v6 = vrot.slane %v1136_v3, %v1139_v43 }
 0x27d   : > { %2889 = vmatmul.mubr.f32.vlgmr.msra.gmra.mrb[4].mxu0 %v1158_v60  ;;  %v1161_v7 = vmul.f32 %v4310_v4, %v4284_v14  ;;  %v1162_v30 = vmul.f32 %v4281_v13, %v4310_v4 }
 0x27e   : > { %2891 = vmatprep.mubr.f32.mxu0 %v1159_v2  ;;  %3213 = vmatpush3.bf16.msra.mxu0 %v4188_v52  ;;  %v1163_v52 = vmul.f32 %v4316_v6, %v4289_v16  ;;  %v1164_v31 = vmul.f32 %v4287_v15, %v4316_v6 }
 0x27f   : > { %3215 = vmatprep.subr.bf16.mxu0 %v4209_v48 }
 0x281   : > { %2892 = vmatmul.mubr.f32.gmra.mrb[6].mxu0 %v1160_v5 }
 0x282   : > { %2894 = vmatprep.mubr.f32.mxu0 %v1161_v7  ;;  %3217 = vmatpush3.bf16.msra.mxu0 %v4209_v48  ;;  %v4342_v48 = vld [vmem:[%s4660_s21] sm:$0xf] }
 0x283   : > { %3219 = vmatprep.subr.bf16.mxu0 %v4219_v59  ;;  %2900 = vmatprep.subr.msk.mxu1 %vm1468_vm4, %v4342_v48 }
 0x284   : > { %2901 = vmatpush3.msk.msra.mxu1 %vm1468_vm4, %v4342_v48 }
 0x285   : > { %2895 = vmatmul.mubr.f32.gmra.mrb[8].mxu0 %v1162_v30 }
 0x286   : > { %2897 = vmatprep.mubr.f32.mxu0 %v1163_v52  ;;  %3221 = vmatpush3.bf16.msra.mxu0 %v4219_v59  ;;  %v1613_v59 = vld [vmem:[#allocation10] sm:$0xff] }
 0x287   : > { %3223 = vmatprep.subr.bf16.mxu0 %v4229_v1 }
 0x289   : > { %2898 = vmatmul.mubr.f32.gmra.mrb[10].mxu0 %v1164_v31 }
 0x28a   : > { %3225 = vmatpush3.bf16.msra.mxu0 %v4229_v1  ;;  %v1614_v1 = vld [vmem:[#allocation10 + $0x8] sm:$0xff] }
 0x28b   : > { %3227 = vmatprep.subr.bf16.mxu0 %v4239_v49 }
 0x28e   : > { %3229 = vmatpush3.bf16.msra.mxu0 %v4239_v49  ;;  %v4350_v49 = vpack.c.bf16 %v1614_v1, %v1613_v59 }
 0x28f   : > { %3231 = vmatprep.subr.bf16.mxu0 %v4250_v36 }
 0x290   : > { %3179 = vmatprep.subr.bf16.mxu1 %v4350_v49 }
 0x292   : > { %3233 = vmatpush3.bf16.msra.mxu0 %v4250_v36  ;;  %v1289_v36 = vpop.permute.xlu0 %1288 }
 0x293   : > { %3235 = vmatprep.subr.bf16.mxu0 %v4260_v8 }
 0x296   : > { %3237 = vmatpush3.bf16.msra.mxu0 %v4260_v8  ;;  %v1299_v8 = vpop.permute.xlu1 %1298  ;;  %v1294_v50 = vpop.permute.xlu0 %1293 }
 0x297   : > { %3239 = vmatprep.subr.bf16.mxu0 %v4274_v10 }
 0x29a   : > { %3241 = vmatpush3.bf16.msra.mxu0 %v4274_v10  ;;  %v1304_v9 = vpop.permute.xlu1 %1303  ;;  %v1309_v33 = vpop.permute.xlu0 %1308 }
 0x29b   : > { %3014 = vmatprep.subr.msk.mxu0 %vm1468_vm4, %v4342_v48 }
 0x29e   : > { %v1314_v20 = vpop.permute.xlu1 %1313  ;;  %v1319_v38 = vpop.permute.xlu0 %1318 }
 0x2a2   : > { %v1324_v28 = vpop.permute.xlu1 %1323 }
 0x350   : > { %v2890_v10 = vpop.f32.mrb[4].mxu0 }
 0x351   : > { %v1327_v11 = vadd.f32 %v2890_v10, %v1294_v50  ;;  %v1247_v12 = vpop.f32.mrb[5].mxu0 }
 0x352   : > { %v1326_v13 = vadd.f32 %v1289_v36, %v1247_v12 }
 0x353   : > { %v1336_v14 = vsel %vm1334_vm5, %v1327_v11, -inf }
 0x354   : > { %v1335_v15 = vsel %vm1334_vm5, %v1326_v13, -inf  ;;  %v2893_v16 = vpop.f32.mrb[6].mxu0 }
 0x355   : > { %v1337_v17 = vmax.f32 %v1335_v15, %v1336_v14  ;;  %v1329_v18 = vadd.f32 %v2893_v16, %v1304_v9  ;;  %v1257_v19 = vpop.f32.mrb[7].mxu0 }
 0x356   : > { %v1328_v32 = vadd.f32 %v1299_v8, %v1257_v19 }
 0x357   : > { %v1338_v62 = vrot.slane %v1337_v17, 4  ;;  %v1345_v21 = vsel %vm1334_vm5, %v1329_v18, -inf }
 0x358   : > { %v1344_v34 = vsel %vm1334_vm5, %v1328_v32, -inf  ;;  %v2896_v35 = vpop.f32.mrb[8].mxu0 }
 0x359   : > { %v1339_v63 = vmax.f32 %v1337_v17, %v1338_v62  ;;  %v1346_v22 = vmax.f32 %v1344_v34, %v1345_v21  ;;  %v1331_v23 = vadd.f32 %v2896_v35, %v1314_v20  ;;  %v1267_v24 = vpop.f32.mrb[9].mxu0 }
 0x35a   : > { %v1330_v25 = vadd.f32 %v1309_v33, %v1267_v24 }
 0x35b   : > { %v1340_v26 = vrot.slane %v1339_v63, 2  ;;  %v1347_v0 = vrot.slane %v1346_v22, 4  ;;  %v1354_v27 = vsel %vm1334_vm5, %v1331_v23, -inf }
 0x35c   : > { %v1353_v29 = vsel %vm1334_vm5, %v1330_v25, -inf  ;;  %v2899_v37 = vpop.f32.mrb[10].mxu0 }
 0x35d   : > { %v1341_v46 = vmax.f32 %v1339_v63, %v1340_v26  ;;  %v1348_v47 = vmax.f32 %v1346_v22, %v1347_v0  ;;  %v1355_v39 = vmax.f32 %v1353_v29, %v1354_v27  ;;  %v1333_v40 = vadd.f32 %v2899_v37, %v1324_v28  ;;  %v1277_v42 = vpop.f32.mrb[11].mxu0 }
 0x35e   : > { %v1332_v53 = vadd.f32 %v1319_v38, %v1277_v42 }
 0x35f   : > { %v1342_v54 = vrot.slane %v1341_v46, 1  ;;  %v1349_v41 = vrot.slane %v1348_v47, 2  ;;  %v1356_v55 = vrot.slane %v1355_v39, 4  ;;  %v1363_v43 = vsel %vm1334_vm5, %v1333_v40, -inf }
 0x360   : > { %v1362_v44 = vsel %vm1334_vm5, %v1332_v53, -inf }
 0x361   : > { %v1343_v45 = vmax.f32 %v1341_v46, %v1342_v54  ;;  %v1350_v51 = vmax.f32 %v1348_v47, %v1349_v41  ;;  %v1357_v57 = vmax.f32 %v1355_v39, %v1356_v55  ;;  %v1364_v60 = vmax.f32 %v1362_v44, %v1363_v43 }
 0x363   : > { %v1371_v61 = vsub.f32 %v1326_v13, %v1343_v45  ;;  %v1372_v2 = vsub.f32 %v1327_v11, %v1343_v45  ;;  %v1351_v3 = vrot.slane %v1350_v51, 1  ;;  %v1358_v5 = vrot.slane %v1357_v57, 2 }
 0x364   : > { %v1365_v7 = vrot.slane %v1364_v60, 4 }
 0x365   : > { %v1379_v30 = vmul.f32 1.442695, %v1371_v61  ;;  %v1381_v52 = vmul.f32 1.442695, %v1372_v2  ;;  %v1352_v31 = vmax.f32 %v1350_v51, %v1351_v3  ;;  %v1359_v59 = vmax.f32 %v1357_v57, %v1358_v5 }
 0x366   : > { %v1366_v1 = vmax.f32 %v1364_v60, %v1365_v7 }
 0x367   : > { %3341 = vpow2.f32 %v1379_v30  ;;  %v1373_v36 = vsub.f32 %v1328_v32, %v1352_v31  ;;  %v1374_v8 = vsub.f32 %v1329_v18, %v1352_v31  ;;  %v1360_v50 = vrot.slane %v1359_v59, 1 }
 0x368   : > { %3343 = vpow2.f32 %v1381_v52  ;;  %v1367_v9 = vrot.slane %v1366_v1, 2 }
 0x369   : > { %v1383_v10 = vmul.f32 1.442695, %v1373_v36  ;;  %v1385_v12 = vmul.f32 1.442695, %v1374_v8  ;;  %v1361_v14 = vmax.f32 %v1359_v59, %v1360_v50  ;;  %v1615_v50 = vld [vmem:[#allocation10 + $0x10] sm:$0xff] }
 0x36a   : > { %v1368_v15 = vmax.f32 %v1366_v1, %v1367_v9  ;;  %v1616_v9 = vld [vmem:[#allocation10 + $0x18] sm:$0xff] }
 0x36b   : > { %3345 = vpow2.f32 %v1383_v10  ;;  %v1375_v11 = vsub.f32 %v1330_v25, %v1361_v14  ;;  %v1376_v13 = vsub.f32 %v1331_v23, %v1361_v14 }
 0x36c   : > { %3347 = vpow2.f32 %v1385_v12  ;;  %v1369_v16 = vrot.slane %v1368_v15, 1 }
 0x36d   : > { %v1387_v17 = vmul.f32 1.442695, %v1375_v11  ;;  %v1389_v19 = vmul.f32 1.442695, %v1376_v13  ;;  %v3182_v13 = vpack.c.bf16 %v1616_v9, %v1615_v50 }
 0x36e   : > { %v1370_v20 = vmax.f32 %v1368_v15, %v1369_v16  ;;  %v1617_v16 = vld [vmem:[#allocation10 + $0x20] sm:$0xff] }
 0x36f   : > { %3349 = vpow2.f32 %v1387_v17  ;;  %v1618_v17 = vld [vmem:[#allocation10 + $0x28] sm:$0xff] }
 0x370   : > { %3351 = vpow2.f32 %v1389_v19  ;;  %v1377_v33 = vsub.f32 %v1332_v53, %v1370_v20  ;;  %v1378_v32 = vsub.f32 %v1333_v40, %v1370_v20 }
 0x371   : > { %v3342_v18 = vpop.eup %3341 }
 0x372   : > { %v3344_v62 = vpop.eup %3343  ;;  %v1395_v21 = vsel %vm1334_vm5, %v3342_v18, 0.0  ;;  %v1391_v34 = vmul.f32 1.442695, %v1377_v33  ;;  %v1393_v35 = vmul.f32 1.442695, %v1378_v32  ;;  %v3186_v32 = vpack.c.bf16 %v1618_v17, %v1617_v16 }
 0x373   : > { %v1396_v63 = vsel %vm1334_vm5, %v3344_v62, 0.0 }
 0x374   : > { %v1397_v22 = vadd.f32 %v1396_v63, %v1395_v21  ;;  %3353 = vpow2.f32 %v1391_v34 }
 0x375   : > { %v3346_v23 = vpop.eup %3345  ;;  %3355 = vpow2.f32 %v1393_v35 }
 0x376   : > { %v3348_v24 = vpop.eup %3347  ;;  %v1398_v25 = vrot.slane %v1397_v22, 4  ;;  %v1404_v26 = vsel %vm1334_vm5, %v3346_v23, 0.0 }
 0x377   : > { %v1405_v0 = vsel %vm1334_vm5, %v3348_v24, 0.0 }
 0x378   : > { %v1399_v27 = vadd.f32 %v1398_v25, %v1397_v22  ;;  %v1406_v28 = vadd.f32 %v1405_v0, %v1404_v26  ;;  %v1622_v22 = vld [vmem:[#allocation10 + $0x48] sm:$0xff]  ;;  %v1623_v0 = vld [vmem:[#allocation10 + $0x50] sm:$0xff] }
 0x379   : > { %v3350_v29 = vpop.eup %3349 }
 0x37a   : > { %v3352_v37 = vpop.eup %3351  ;;  %v1400_v38 = vrot.slane %v1399_v27, 2  ;;  %v1407_v46 = vrot.slane %v1406_v28, 4  ;;  %v1413_v47 = vsel %vm1334_vm5, %v3350_v29, 0.0 }
 0x37b   : > { %v1414_v39 = vsel %vm1334_vm5, %v3352_v37, 0.0 }
 0x37c   : > { %v1401_v40 = vadd.f32 %v1400_v38, %v1399_v27  ;;  %v1408_v42 = vadd.f32 %v1407_v46, %v1406_v28  ;;  %v1415_v53 = vadd.f32 %v1414_v39, %v1413_v47  ;;  %v1624_v27 = vld [vmem:[#allocation10 + $0x58] sm:$0xff]  ;;  %v4379_v28 = vld [vmem:[%s4004_s18] sm:$0xff]  ;;  %v1626_v38 = vld [vmem:[#allocation10 + $0x68] sm:$0xff] }
 0x37d   : > { %v1627_v47 = vld [vmem:[#allocation10 + $0x70] sm:$0xff]  ;;  %v1628_v39 = vld [vmem:[#allocation10 + $0x78] sm:$0xff] }
 0x37e   : > { %v3354_v54 = vpop.eup %3353  ;;  %v1409_v41 = vrot.slane %v1408_v42, 2  ;;  %v1416_v55 = vrot.slane %v1415_v53, 4  ;;  %v1402_v43 = vrot.slane %v1401_v40, 1 }
 0x37f   : > { %v3356_v44 = vpop.eup %3355  ;;  %v1422_v45 = vsel %vm1334_vm5, %v3354_v54, 0.0 }
 0x380   : > { %v1410_v51 = vadd.f32 %v1409_v41, %v1408_v42  ;;  %v1417_v57 = vadd.f32 %v1416_v55, %v1415_v53  ;;  %v1423_v60 = vsel %vm1334_vm5, %v3356_v44, 0.0  ;;  %v1403_v61 = vadd.f32 %v1402_v43, %v1401_v40  ;;  %v4385_v42 = vld [vmem:[%s4004_s18 + $0x8] sm:$0xff]  ;;  %v4389_v53 = vld [vmem:[%s4004_s18 + $0x10] sm:$0xff]  ;;  %v4399_v41 = vld [vmem:[%s4004_s18 + $0x20] sm:$0xff] }
 0x381   : > { %v1424_v2 = vadd.f32 %v1423_v60, %v1422_v45  ;;  %v3206_v40 = vpack.c.bf16 %v1628_v39, %v1627_v47  ;;  %v4403_v55 = vld [vmem:[%s4004_s18 + $0x28] sm:$0xff]  ;;  %v4407_v43 = vld [vmem:[%s4004_s18 + $0x30] sm:$0xff]  ;;  %v4415_v45 = vld [vmem:[%s4004_s18 + $0x40] sm:$0xff] }
 0x382   : > { %v1418_v3 = vrot.slane %v1417_v57, 2  ;;  %3357 = vrcp.f32 %v1403_v61  ;;  %v1411_v5 = vrot.slane %v1410_v51, 1  ;;  %v4427_v60 = vld [vmem:[%s4004_s18 + $0x58] sm:$0xff] }
 0x383   : > { %v1425_v7 = vrot.slane %v1424_v2, 4 }
 0x384   : > { %v1419_v30 = vadd.f32 %v1418_v3, %v1417_v57  ;;  %v1412_v52 = vadd.f32 %v1411_v5, %v1410_v51  ;;  %v4419_v51 = vld [vmem:[%s4004_s18 + $0x48] sm:$0xff]  ;;  %v4423_v57 = vld [vmem:[%s4004_s18 + $0x50] sm:$0xff] }
 0x385   : > { %v1426_v31 = vadd.f32 %v1425_v7, %v1424_v2  ;;  %v3409_v2 = vld [vmem:[%s3948_s17 + $0x8] sm:$0xff]  ;;  %v3410_v7 = vld [vmem:[%s3948_s17] sm:$0xff] }
 0x386   : > { %3359 = vrcp.f32 %v1412_v52  ;;  %v1420_v59 = vrot.slane %v1419_v30, 1 }
 0x387   : > { %v1427_v1 = vrot.slane %v1426_v31, 2 }
 0x388   : > { %v1421_v36 = vadd.f32 %v1420_v59, %v1419_v30  ;;  %v3411_v59 = vld [vmem:[%s3948_s17 + $0x18] sm:$0xff] }
 0x389   : > { %v1428_v8 = vadd.f32 %v1427_v1, %v1426_v31 }
 0x38a   : > { %3361 = vrcp.f32 %v1421_v36 }
 0x38b   : > { %v1429_v10 = vrot.slane %v1428_v8, 1 }
 0x38c   : > { %v3358_v12 = vpop.eup %3357 }
 0x38d   : > { %v1435_v14 = vmul.f32 %v3358_v12, %v3342_v18  ;;  %v1436_v15 = vmul.f32 %v3358_v12, %v3344_v62  ;;  %v1430_v11 = vadd.f32 %v1429_v10, %v1428_v8  ;;  %v1619_v18 = vld [vmem:[#allocation10 + $0x30] sm:$0xff]  ;;  %v1620_v62 = vld [vmem:[#allocation10 + $0x38] sm:$0xff]  ;;  %v3413_v12 = vld [vmem:[%s3948_s17 + $0x28] sm:$0xff] }
 0x38e   : > { %v3190_v63 = vpack.c.bf16 %v1620_v62, %v1619_v18  ;;  %v3412_v8 = vld [vmem:[%s3948_s17 + $0x10] sm:$0xff] }
 0x38f   : > { %2902 = vmatprep.mubr.msk.f32.mxu1 %vm1334_vm5, %v1435_v14  ;;  %3363 = vrcp.f32 %v1430_v11  ;;  %v3414_v11 = vld [vmem:[%s3948_s17 + $0x20] sm:$0xff] }
 0x390   : > { %v3360_v19 = vpop.eup %3359  ;;  %2903 = vmatmul.mubr.msk.f32.vlgmr.msra.gmra.mrb[10].mxu1 %vm1334_vm5, %v1436_v15 }
 0x391   : > { %3181 = vmatpush3.bf16.msra.mxu1 %v4350_v49  ;;  %v1437_v20 = vmul.f32 %v3360_v19, %v3346_v23  ;;  %v1438_v33 = vmul.f32 %v3360_v19, %v3348_v24  ;;  %v1621_v49 = vld [vmem:[#allocation10 + $0x40] sm:$0xff]  ;;  %v3415_v19 = vld [vmem:[%s3948_s17 + $0x38] sm:$0xff] }
 0x392   : > { %3183 = vmatprep.subr.bf16.mxu1 %v3182_v13  ;;  %v3194_v26 = vpack.c.bf16 %v1622_v22, %v1621_v49 }
 0x393   : > { %2905 = vmatprep.mubr.msk.f32.mxu1 %vm1334_vm5, %v1437_v20 }
 0x394   : > { %v3362_v21 = vpop.eup %3361  ;;  %2906 = vmatmul.mubr.msk.f32.gmra.mrb[12].mxu1 %vm1334_vm5, %v1438_v33 }
 0x395   : > { %3185 = vmatpush3.bf16.msra.mxu1 %v3182_v13  ;;  %v1439_v34 = vmul.f32 %v3362_v21, %v3350_v29  ;;  %v1440_v35 = vmul.f32 %v3362_v21, %v3352_v37  ;;  %v3198_v29 = vpack.c.bf16 %v1624_v27, %v1623_v0  ;;  %v1625_v37 = vld [vmem:[#allocation10 + $0x60] sm:$0xff] }
 0x396   : > { %3187 = vmatprep.subr.bf16.mxu1 %v3186_v32  ;;  %v3202_v46 = vpack.c.bf16 %v1626_v38, %v1625_v37 }
 0x397   : > { %2908 = vmatprep.mubr.msk.f32.mxu1 %vm1334_vm5, %v1439_v34 }
 0x398   : > { %2909 = vmatmul.mubr.msk.f32.gmra.mrb[14].mxu1 %vm1334_vm5, %v1440_v35 }
 0x399   : > { %v3364_v23 = vpop.eup %3363  ;;  %3189 = vmatpush3.bf16.msra.mxu1 %v3186_v32  ;;  %v3416_v32 = vld [vmem:[%s3948_s17 + $0x30] sm:$0xff]  ;;  %s2508_s17 = sshll.u32 %s3944_s3, 2 }
 0x39a   : > { %v1441_v24 = vmul.f32 %v3364_v23, %v3354_v54  ;;  %3191 = vmatprep.subr.bf16.mxu1 %v3190_v63  ;;  %v1442_v25 = vmul.f32 %v3364_v23, %v3356_v44  ;;  %v4395_v54 = vld [vmem:[%s4004_s18 + $0x18] sm:$0xff]  ;;  %s571_s2 = scalar_lea.vmem [#allocation11], %s2508_s17 }
 0x39b   : > { %v4411_v44 = vld [vmem:[%s4004_s18 + $0x38] sm:$0xff]  ;;  %s2541_s18 = sshll.u32 %s3739_s29, 6  ;;  %s2347_s19 = sshll.u32 %s571_s2, 4  ;;  %s4573_s19 = int_to_ptr.vmem [resolvable:$true] %s2347_s19 }
 0x39c   : > { %2911 = vmatprep.mubr.msk.f32.mxu1 %vm1334_vm5, %v1441_v24  ;;  %s4571_s23 = scalar_lea.hbm %s4661_s25, %s2541_s18  ;;  %s3559_s24 = scalar_lea.vmem %s4573_s19, 64 }
 0x39d   : > { %2912 = vmatmul.mubr.msk.f32.gmra.mrb[16].mxu1 %vm1334_vm5, %v1442_v25  ;;  %p3560_p5 = scmp.ne.s32.totalorder %s4573_s19, %s3559_s24  ;;  %s3647_s29 = smov [#allocation11]  }
 0x39e   : > { %3193 = vmatpush3.bf16.msra.mxu1 %v3190_v63  ;;  %2946 = vmatprep.mubr.f32.mxu1 %v4379_v28  ;;  %s3563_s14 = sshll.u32 %s3647_s29, 4  ;;  %s3564_s14 = int_to_ptr.vmem [resolvable:$false] %s3563_s14 }
 0x39f   : > { %3195 = vmatprep.subr.bf16.mxu1 %v3194_v26  ;;  %p3561_p7 = pnand %p3560_p5, %p3889_p10  ;;  %s3565_s16 = scalar_lea.vmem %s3564_s14, 128 }
 0x3a0   : > { %p3566_p1 = scmp.lt.s32.totalorder %s4573_s19, %s3564_s14  ;;  %p3567_p2 = scmp.lt.s32.totalorder %s3565_s16, %s3559_s24 }
 0x3a1   : > { %p3562_p12 = pneg %p3561_p7 }
 0x3a2   : > { %3197 = vmatpush3.bf16.msra.mxu1 %v3194_v26  ;;  %p3568_p13 = por %p3567_p2, %p3566_p1 }
 0x3a3   : > { %3199 = vmatprep.subr.bf16.mxu1 %v3198_v29 }
 0x3a4   : > { %p3569_p9 = pnand %p3568_p13, %p3562_p12 }
 0x3a6   : > { %3201 = vmatpush3.bf16.msra.mxu1 %v3198_v29 }
 0x3a7   : > { %3203 = vmatprep.subr.bf16.mxu1 %v3202_v46 }
 0x3aa   : > { %3205 = vmatpush3.bf16.msra.mxu1 %v3202_v46 }
 0x3ab   : > { %3207 = vmatprep.subr.bf16.mxu1 %v3206_v40 }
 0x3ae   : > { %3209 = vmatpush3.bf16.msra.mxu1 %v3206_v40 }
 0x3af   : > { %3242 = vmatprep.subr.msk.mxu1 %vm1468_vm4, %v4342_v48 }
 0x3b1   : > { %2947 = vmatmul.mubr.f32.vlgmr.msra.gmra.mrb[18].mxu1 %v4385_v42 }
 0x3b2   : > { %2949 = vmatprep.mubr.f32.mxu1 %v4389_v53  ;;  %3243 = vmatpush3.msk.msra.mxu1 %vm1468_vm4, %v4342_v48 }
 0x3b5   : > { %2950 = vmatmul.mubr.f32.gmra.mrb[20].mxu1 %v4395_v54 }
 0x3b6   : > { %2952 = vmatprep.mubr.f32.mxu1 %v4399_v41 }
 0x3b9   : > { %2953 = vmatmul.mubr.f32.gmra.mrb[22].mxu1 %v4403_v55 }
 0x3ba   : > { %2955 = vmatprep.mubr.f32.mxu1 %v4407_v43 }
 0x3bd   : > { %2956 = vmatmul.mubr.f32.gmra.mrb[24].mxu1 %v4411_v44 }
 0x3be   : > { %2958 = vmatprep.mubr.f32.mxu1 %v4415_v45 }
 0x3c1   : > { %2959 = vmatmul.mubr.f32.gmra.mrb[26].mxu1 %v4419_v51 }
 0x3c2   : > { %2961 = vmatprep.mubr.f32.mxu1 %v4423_v57 }
 0x3c5   : > { %2962 = vmatmul.mubr.f32.gmra.mrb[28].mxu1 %v4427_v60 }
 0x463   : > { %v2904_v61 = vpop.f32.mrb[10].mxu1 }
 0x464   : > { %v1578_v3 = vmul.f32 %v3409_v2, %v2904_v61  ;;  %v1538_v5 = vpop.f32.mrb[11].mxu1 }
 0x465   : > { %v1577_v30 = vmul.f32 %v3410_v7, %v1538_v5  ;;  %v1911_v5 = vpop.permute.xlu1 %1910 }
 0x467   : > { %v4432_v52 = vadd.f32 %v1578_v3, %v1577_v30  ;;  %v2907_v31 = vpop.f32.mrb[12].mxu1  ;;  %v1906_v3 = vpop.permute.xlu0 %1905 }
 0x468   : > { %v1580_v1 = vmul.f32 %v3411_v59, %v2907_v31  ;;  %v1548_v36 = vpop.f32.mrb[13].mxu1 }
 0x469   : > { %v1579_v50 = vmul.f32 %v3412_v8, %v1548_v36  ;;  %v1926_v30 = vpop.permute.xlu1 %1925 }
 0x46b   : > { %v4436_v9 = vadd.f32 %v1580_v1, %v1579_v50  ;;  %v2910_v10 = vpop.f32.mrb[14].mxu1  ;;  %v1921_v7 = vpop.permute.xlu0 %1920 }
 0x46c   : > { %v1582_v14 = vmul.f32 %v3413_v12, %v2910_v10  ;;  %v1558_v15 = vpop.f32.mrb[15].mxu1 }
 0x46d   : > { %v1581_v13 = vmul.f32 %v3414_v11, %v1558_v15  ;;  %v1931_v8 = vpop.permute.xlu1 %1930 }
 0x46f   : > { %v4440_v16 = vadd.f32 %v1582_v14, %v1581_v13  ;;  %v1916_v1 = vpop.permute.xlu0 %1915 }
 0x470   : > { %v2913_v17 = vpop.f32.mrb[16].mxu1 }
 0x471   : > { %v1584_v20 = vmul.f32 %v3415_v19, %v2913_v17  ;;  %v1568_v33 = vpop.f32.mrb[17].mxu1 }
 0x472   : > { %v1583_v18 = vmul.f32 %v3416_v32, %v1568_v33 }
 0x473   : > { %v1936_v11 = vpop.permute.xlu0 %1935 }
 0x474   : > { %v4444_v62 = vadd.f32 %v1584_v20, %v1583_v18  ;;  %v1941_v20 = vpop.permute.xlu1 %1940 }
 0x484   : > { %v2948_v21 = vpop.f32.mrb[18].mxu1 }
 0x485   : > { %v1707_v34 = vpop.f32.mrb[19].mxu1  ;;  %v1767_v63 = vmul.f32 %v2948_v21, %v4300_v56 }
 0x486   : > { %v1766_v35 = vmul.f32 %v1707_v34, %v4300_v56 }
 0x488   : > { %v2951_v49 = vpop.f32.mrb[20].mxu1  ;;  %2996 = vmatprep.mubr.f32.mxu0 %v1766_v35 }
 0x489   : > { %v1717_v22 = vpop.f32.mrb[21].mxu1  ;;  %2997 = vmatmul.mubr.f32.vlgmr.msra.gmra.mrb[12].mxu0 %v1767_v63  ;;  %v1769_v24 = vmul.f32 %v2951_v49, %v4302_v58 }
 0x48a   : > { %v1768_v23 = vmul.f32 %v1717_v22, %v4300_v56  ;;  %3015 = vmatpush3.msk.msra.mxu0 %vm1468_vm4, %v4342_v48 }
 0x48c   : > { %v2954_v25 = vpop.f32.mrb[22].mxu1  ;;  %2999 = vmatprep.mubr.f32.mxu0 %v1768_v23 }
 0x48d   : > { %v1727_v26 = vpop.f32.mrb[23].mxu1  ;;  %3000 = vmatmul.mubr.f32.gmra.mrb[14].mxu0 %v1769_v24  ;;  %v1771_v27 = vmul.f32 %v2954_v25, %v4302_v58 }
 0x48e   : > { %v1770_v0 = vmul.f32 %v1727_v26, %v4302_v58  ;;  %v1946_v26 = vpop.permute.xlu0 %1945 }
 0x490   : > { %v2957_v29 = vpop.f32.mrb[24].mxu1  ;;  %3002 = vmatprep.mubr.f32.mxu0 %v1770_v0 }
 0x491   : > { %v1737_v37 = vpop.f32.mrb[25].mxu1  ;;  %3003 = vmatmul.mubr.f32.gmra.mrb[16].mxu0 %v1771_v27  ;;  %v1773_v56 = vmul.f32 %v2957_v29, %v4310_v4  ;;  %v1951_v29 = vpop.permute.xlu1 %1950 }
 0x492   : > { %v1772_v38 = vmul.f32 %v1737_v37, %v4310_v4 }
 0x494   : > { %v2960_v46 = vpop.f32.mrb[26].mxu1  ;;  %3005 = vmatprep.mubr.f32.mxu0 %v1772_v38 }
 0x495   : > { %v1747_v48 = vpop.f32.mrb[27].mxu1  ;;  %3006 = vmatmul.mubr.f32.gmra.mrb[18].mxu0 %v1773_v56  ;;  %v1775_v39 = vmul.f32 %v2960_v46, %v4316_v6 }
 0x496   : > { %v1774_v47 = vmul.f32 %v1747_v48, %v4310_v4 }
 0x498   : > { %v2963_v40 = vpop.f32.mrb[28].mxu1  ;;  %3008 = vmatprep.mubr.f32.mxu0 %v1774_v47 }
 0x499   : > { %v1757_v61 = vpop.f32.mrb[29].mxu1  ;;  %3009 = vmatmul.mubr.f32.gmra.mrb[20].mxu0 %v1775_v39  ;;  %v1777_v2 = vmul.f32 %v2963_v40, %v4316_v6 }
 0x49a   : > { %v1776_v58 = vmul.f32 %v1757_v61, %v4316_v6 }
 0x49c   : > { %3011 = vmatprep.mubr.f32.mxu0 %v1776_v58 }
 0x49d   : > { %3012 = vmatmul.mubr.f32.gmra.mrb[22].mxu0 %v1777_v2 }
 0x55c   : > { %v2998_v31 = vpop.f32.mrb[12].mxu0 }
 0x55d   : > { %v4460_v59 = vadd.f32 %v2998_v31, %v1911_v5  ;;  %v1844_v4 = vpop.f32.mrb[13].mxu0  ;;  %v1956_v5 = vpop.permute.xlu0 %1955 }
 0x55e   : > { %v1963_v36 = vadd.f32 %v1906_v3, %v1844_v4  ;;  %v1961_v4 = vpop.permute.xlu1 %1960 }
 0x55f   : > { %v1976_v50 = vsel %vm1334_vm5, %v4460_v59, -inf }
 0x560   : > { %v1975_v10 = vsel %vm1334_vm5, %v1963_v36, -inf  ;;  %v3001_v12 = vpop.f32.mrb[14].mxu0 }
 0x561   : > { %v1977_v6 = vmax.f32 %v1975_v10, %v1976_v50  ;;  %v1854_v14 = vpop.f32.mrb[15].mxu0  ;;  %v4465_v13 = vadd.f32 %v3001_v12, %v1921_v7 }
 0x562   : > { %v1965_v15 = vadd.f32 %v1916_v1, %v1854_v14 }
 0x563   : > { %v1986_v35 = vsel %vm1334_vm5, %v4465_v13, -inf }
 0x564   : > { %v1978_v17 = vsel %vm1334_vm5, %v1965_v15, -inf  ;;  %v3004_v19 = vpop.f32.mrb[16].mxu0 }
 0x565   : > { %v1979_v33 = vmax.f32 %v1977_v6, %v1978_v17  ;;  %v1864_v32 = vpop.f32.mrb[17].mxu0  ;;  %v4468_v18 = vadd.f32 %v3004_v19, %v1931_v8 }
 0x566   : > { %v4470_v21 = vadd.f32 %v1926_v30, %v1864_v32 }
 0x567   : > { %v1980_v34 = vrot.slane %v1979_v33, 4  ;;  %v1989_v0 = vsel %vm1334_vm5, %v4468_v18, -inf }
 0x568   : > { %v1987_v63 = vsel %vm1334_vm5, %v4470_v21, -inf  ;;  %v3007_v49 = vpop.f32.mrb[18].mxu0 }
 0x569   : > { %v1981_v22 = vmax.f32 %v1979_v33, %v1980_v34  ;;  %v1988_v23 = vmax.f32 %v1986_v35, %v1987_v63  ;;  %v4476_v24 = vadd.f32 %v3007_v49, %v1941_v20  ;;  %v1874_v25 = vpop.f32.mrb[19].mxu0 }
 0x56a   : > { %v4480_v27 = vadd.f32 %v1936_v11, %v1874_v25 }
 0x56b   : > { %v1982_v37 = vrot.slane %v1981_v22, 2  ;;  %v1990_v38 = vmax.f32 %v1988_v23, %v1989_v0  ;;  %v1998_v56 = vsel %vm1334_vm5, %v4476_v24, -inf }
 0x56c   : > { %v1997_v46 = vsel %vm1334_vm5, %v4480_v27, -inf  ;;  %v3010_v48 = vpop.f32.mrb[20].mxu0 }
 0x56d   : > { %v1983_v47 = vmax.f32 %v1981_v22, %v1982_v37  ;;  %v1991_v39 = vrot.slane %v1990_v38, 4  ;;  %v1999_v40 = vmax.f32 %v1997_v46, %v1998_v56  ;;  %v1884_v61 = vpop.f32.mrb[21].mxu0  ;;  %v4488_v7 = vadd.f32 %v3010_v48, %v1951_v29 }
 0x56e   : > { %v4486_v58 = vadd.f32 %v1946_v26, %v1884_v61 }
 0x56f   : > { %v1984_v2 = vrot.slane %v1983_v47, 1  ;;  %v1992_v3 = vmax.f32 %v1990_v38, %v1991_v39  ;;  %v2008_v20 = vsel %vm1334_vm5, %v4488_v7, -inf }
 0x570   : > { %v2000_v30 = vsel %vm1334_vm5, %v4486_v58, -inf  ;;  %v3013_v31 = vpop.f32.mrb[22].mxu0 }
 0x571   : > { %v1985_v1 = vmax.f32 %v1983_v47, %v1984_v2  ;;  %v1993_v8 = vrot.slane %v1992_v3, 2  ;;  %v2001_v50 = vmax.f32 %v1999_v40, %v2000_v30  ;;  %v1894_v10 = vpop.f32.mrb[23].mxu0  ;;  %v1974_v12 = vadd.f32 %v3013_v31, %v1961_v4 }
 0x572   : > { %v1973_v6 = vadd.f32 %v1956_v5, %v1894_v10 }
 0x573   : > { %v2019_v14 = vsub.f32 %v1963_v36, %v1985_v1  ;;  %v2020_v11 = vsub.f32 %v4460_v59, %v1985_v1  ;;  %v2021_v17 = vsub.f32 %v1965_v15, %v1985_v1  ;;  %v1994_v19 = vmax.f32 %v1992_v3, %v1993_v8 }
 0x574   : > { %v2002_v33 = vrot.slane %v2001_v50, 4  ;;  %v2009_v32 = vsel %vm1334_vm5, %v1973_v6, -inf  ;;  %v2011_v25 = vsel %vm1334_vm5, %v1974_v12, -inf }
 0x575   : > { %v2031_v34 = vmul.f32 1.442695, %v2019_v14  ;;  %v2033_v35 = vmul.f32 1.442695, %v2020_v11  ;;  %v2035_v63 = vmul.f32 1.442695, %v2021_v17  ;;  %v2010_v49 = vmax.f32 %v2008_v20, %v2009_v32 }
 0x576   : > { %v1995_v22 = vrot.slane %v1994_v19, 1  ;;  %v2003_v23 = vmax.f32 %v2001_v50, %v2002_v33 }
 0x577   : > { %3365 = vpow2.f32 %v2031_v34  ;;  %v2012_v36 = vmax.f32 %v2010_v49, %v2011_v25 }
 0x578   : > { %3367 = vpow2.f32 %v2033_v35  ;;  %v1996_v59 = vmax.f32 %v1994_v19, %v1995_v22  ;;  %v2004_v15 = vrot.slane %v2003_v23, 2 }
 0x579   : > { %3369 = vpow2.f32 %v2035_v63  ;;  %v2013_v26 = vrot.slane %v2012_v36, 4 }
 0x57a   : > { %v2022_v0 = vsub.f32 %v4465_v13, %v1996_v59  ;;  %v2023_v29 = vsub.f32 %v4470_v21, %v1996_v59  ;;  %v2024_v37 = vsub.f32 %v4468_v18, %v1996_v59  ;;  %v2005_v38 = vmax.f32 %v2003_v23, %v2004_v15 }
 0x57b   : > { %v2014_v56 = vmax.f32 %v2012_v36, %v2013_v26 }
 0x57c   : > { %v2037_v46 = vmul.f32 1.442695, %v2022_v0  ;;  %v2039_v48 = vmul.f32 1.442695, %v2023_v29  ;;  %v2041_v47 = vmul.f32 1.442695, %v2024_v37 }
 0x57d   : > { %v2006_v39 = vrot.slane %v2005_v38, 1  ;;  %v2015_v40 = vrot.slane %v2014_v56, 2 }
 0x57e   : > { %3371 = vpow2.f32 %v2037_v46 }
 0x57f   : > { %3373 = vpow2.f32 %v2039_v48  ;;  %v2007_v61 = vmax.f32 %v2005_v38, %v2006_v39  ;;  %v2016_v2 = vmax.f32 %v2014_v56, %v2015_v40 }
 0x580   : > { %3375 = vpow2.f32 %v2041_v47 }
 0x581   : > { %v4500_v3 = vpop.eup %3365  ;;  %v2025_v13 = vsub.f32 %v4480_v27, %v2007_v61  ;;  %v2026_v21 = vsub.f32 %v4476_v24, %v2007_v61  ;;  %v2027_v18 = vsub.f32 %v4486_v58, %v2007_v61  ;;  %v2017_v5 = vrot.slane %v2016_v2, 1 }
 0x582   : > { %v4505_v30 = vpop.eup %3367  ;;  %v2055_v31 = vsel %vm1334_vm5, %v4500_v3, 0.0 }
 0x583   : > { %v4509_v4 = vpop.eup %3369  ;;  %v2056_v1 = vsel %vm1334_vm5, %v4505_v30, 0.0  ;;  %v2043_v8 = vmul.f32 1.442695, %v2025_v13  ;;  %v2045_v50 = vmul.f32 1.442695, %v2026_v21  ;;  %v2018_v10 = vmax.f32 %v2016_v2, %v2017_v5 }
 0x584   : > { %v2057_v14 = vadd.f32 %v2056_v1, %v2055_v31  ;;  %v2058_v24 = vsel %vm1334_vm5, %v4509_v4, 0.0  ;;  %v2047_v27 = vmul.f32 1.442695, %v2027_v18 }
 0x585   : > { %3377 = vpow2.f32 %v2043_v8  ;;  %v2028_v58 = vsub.f32 %v4488_v7, %v2018_v10  ;;  %v2029_v11 = vsub.f32 %v1973_v6, %v2018_v10  ;;  %v2030_v17 = vsub.f32 %v1974_v12, %v2018_v10 }
 0x586   : > { %v2059_v19 = vadd.f32 %v2058_v24, %v2057_v14  ;;  %3379 = vpow2.f32 %v2045_v50 }
 0x587   : > { %3381 = vpow2.f32 %v2047_v27  ;;  %v2049_v20 = vmul.f32 1.442695, %v2028_v58  ;;  %v2051_v33 = vmul.f32 1.442695, %v2029_v11  ;;  %v2053_v32 = vmul.f32 1.442695, %v2030_v17 }
 0x588   : > { %v4516_v34 = vpop.eup %3371  ;;  %v2060_v35 = vrot.slane %v2059_v19, 4 }
 0x589   : > { %v3374_v63 = vpop.eup %3373  ;;  %v2066_v49 = vsel %vm1334_vm5, %v4516_v34, 0.0  ;;  %3383 = vpow2.f32 %v2049_v20 }
 0x58a   : > { %v3376_v22 = vpop.eup %3375  ;;  %v2061_v23 = vadd.f32 %v2060_v35, %v2059_v19  ;;  %v2067_v7 = vsel %vm1334_vm5, %v3374_v63, 0.0  ;;  %3385 = vpow2.f32 %v2051_v33 }
 0x58b   : > { %v2068_v12 = vadd.f32 %v2067_v7, %v2066_v49  ;;  %3387 = vpow2.f32 %v2053_v32  ;;  %v2069_v25 = vsel %vm1334_vm5, %v3376_v22, 0.0 }
 0x58c   : > { %v2062_v6 = vrot.slane %v2061_v23, 2 }
 0x58d   : > { %v2070_v36 = vadd.f32 %v2069_v25, %v2068_v12 }
 0x58e   : > { %v2063_v59 = vadd.f32 %v2062_v6, %v2061_v23 }
 0x58f   : > { %v3378_v15 = vpop.eup %3377  ;;  %v2071_v26 = vrot.slane %v2070_v36, 4 }
 0x590   : > { %v3380_v0 = vpop.eup %3379  ;;  %v2064_v29 = vrot.slane %v2063_v59, 1  ;;  %v2077_v37 = vsel %vm1334_vm5, %v3378_v15, 0.0 }
 0x591   : > { %v3382_v38 = vpop.eup %3381  ;;  %v2072_v56 = vadd.f32 %v2071_v26, %v2070_v36  ;;  %v2078_v46 = vsel %vm1334_vm5, %v3380_v0, 0.0 }
 0x592   : > { %v2065_v48 = vadd.f32 %v2064_v29, %v2063_v59  ;;  %v2079_v47 = vadd.f32 %v2078_v46, %v2077_v37  ;;  %v2080_v61 = vsel %vm1334_vm5, %v3382_v38, 0.0 }
 0x593   : > { %v3384_v39 = vpop.eup %3383  ;;  %v2073_v40 = vrot.slane %v2072_v56, 2 }
 0x594   : > { %v3386_v2 = vpop.eup %3385  ;;  %3389 = vrcp.f32 %v2065_v48  ;;  %v2081_v13 = vadd.f32 %v2080_v61, %v2079_v47  ;;  %v2088_v21 = vsel %vm1334_vm5, %v3384_v39, 0.0  ;;  %v1593_v61 = vrot.slane %v4436_v9, 4 }
 0x595   : > { %v3388_v18 = vpop.eup %3387  ;;  %v2074_v5 = vadd.f32 %v2073_v40, %v2072_v56  ;;  %v2089_v31 = vsel %vm1334_vm5, %v3386_v2, 0.0 }
 0x596   : > { %v2082_v1 = vrot.slane %v2081_v13, 4  ;;  %v2090_v8 = vadd.f32 %v2089_v31, %v2088_v21  ;;  %v2091_v10 = vsel %vm1334_vm5, %v3388_v18, 0.0  ;;  %v1594_v31 = vadd.f32 %v1593_v61, %v4436_v9 }
 0x597   : > { %v2075_v50 = vrot.slane %v2074_v5, 1 }
 0x598   : > { %v2083_v14 = vadd.f32 %v2082_v1, %v2081_v13  ;;  %v2092_v24 = vadd.f32 %v2091_v10, %v2090_v8 }
 0x599   : > { %v2076_v27 = vadd.f32 %v2075_v50, %v2074_v5  ;;  %v1600_v50 = vrot.slane %v4440_v16, 4 }
 0x59a   : > { %v2084_v58 = vrot.slane %v2083_v14, 2  ;;  %v2093_v11 = vrot.slane %v2092_v24, 4 }
 0x59b   : > { %3391 = vrcp.f32 %v2076_v27 }
 0x59c   : > { %v2085_v17 = vadd.f32 %v2084_v58, %v2083_v14  ;;  %v2094_v19 = vadd.f32 %v2093_v11, %v2092_v24 }
 0x59e   : > { %v3390_v20 = vpop.eup %3389  ;;  %v2086_v33 = vrot.slane %v2085_v17, 1  ;;  %v2095_v32 = vrot.slane %v2094_v19, 2 }
 0x59f   : > { %v2103_v35 = vmul.f32 %v3390_v20, %v4500_v3  ;;  %v2105_v49 = vmul.f32 %v3390_v20, %v4509_v4  ;;  %v2104_v23 = vmul.f32 %v3390_v20, %v4505_v30 }
 0x5a0   : > { %v2087_v7 = vadd.f32 %v2086_v33, %v2085_v17  ;;  %v2096_v12 = vadd.f32 %v2095_v32, %v2094_v19 }
 0x5a1   : > { %3016 = vmatprep.mubr.msk.f32.mxu0 %vm1334_vm5, %v2103_v35  ;;  %3019 = vmatprep.mubr.msk.f32.mxu1 %vm1334_vm5, %v2105_v49 }
 0x5a2   : > { %3393 = vrcp.f32 %v2087_v7  ;;  %v2097_v6 = vrot.slane %v2096_v12, 1  ;;  %3017 = vmatmul.mubr.msk.f32.vlgmr.msra.gmra.mrb[24].mxu0 %vm1334_vm5, %v2104_v23 }
 0x5a4   : > { %v2098_v25 = vadd.f32 %v2097_v6, %v2096_v12 }
 0x5a5   : > { %v3392_v36 = vpop.eup %3391 }
 0x5a6   : > { %3395 = vrcp.f32 %v2098_v25  ;;  %v2106_v59 = vmul.f32 %v3392_v36, %v4516_v34  ;;  %v2107_v3 = vmul.f32 %v3392_v36, %v3374_v63  ;;  %v2108_v26 = vmul.f32 %v3392_v36, %v3376_v22 }
 0x5a8   : > { %3020 = vmatmul.mubr.msk.f32.vlgmr.msra.gmra.mrb[30].mxu1 %vm1334_vm5, %v2106_v59 }
 0x5a9   : > { %3022 = vmatprep.mubr.msk.f32.mxu1 %vm1334_vm5, %v2107_v3 }
 0x5ac   : > { %v3394_v30 = vpop.eup %3393  ;;  %3023 = vmatmul.mubr.msk.f32.gmra.mrb[32].mxu1 %vm1334_vm5, %v2108_v26 }
 0x5ad   : > { %v2109_v4 = vmul.f32 %v3394_v30, %v3378_v15  ;;  %v2110_v29 = vmul.f32 %v3394_v30, %v3380_v0  ;;  %v2111_v37 = vmul.f32 %v3394_v30, %v3382_v38  ;;  %v1586_v38 = vrot.slane %v4432_v52, 4 }
 0x5af   : > { %3025 = vmatprep.mubr.msk.f32.mxu1 %vm1334_vm5, %v2109_v4  ;;  %v1587_v40 = vadd.f32 %v1586_v38, %v4432_v52 }
 0x5b0   : > { %v3396_v56 = vpop.eup %3395  ;;  %3026 = vmatmul.mubr.msk.f32.gmra.mrb[34].mxu1 %vm1334_vm5, %v2110_v29 }
 0x5b1   : > { %3028 = vmatprep.mubr.msk.f32.mxu1 %vm1334_vm5, %v2111_v37  ;;  %v2112_v34 = vmul.f32 %v3396_v56, %v3384_v39  ;;  %v2113_v63 = vmul.f32 %v3396_v56, %v3386_v2  ;;  %v2114_v22 = vmul.f32 %v3396_v56, %v3388_v18  ;;  %v1588_v21 = vrot.slane %v1587_v40, 2 }
 0x5b3   : > { %v1589_v52 = vadd.f32 %v1588_v21, %v1587_v40 }
 0x5b4   : > { %3029 = vmatmul.mubr.msk.f32.gmra.mrb[36].mxu1 %vm1334_vm5, %v2112_v34 }
 0x5b5   : > { %3031 = vmatprep.mubr.msk.f32.mxu1 %vm1334_vm5, %v2113_v63  ;;  %v1590_v20 = vrot.slane %v1589_v52, 1 }
 0x5b7   : > { %v1591_v25 = vadd.f32 %v1590_v20, %v1589_v52 }
 0x5b8   : > { %3032 = vmatmul.mubr.msk.f32.gmra.mrb[38].mxu1 %vm1334_vm5, %v2114_v22 }
 0x675   : > { %v3018_v46 = vpop.f32.mrb[24].mxu0 }
 0x676   : > { %v2277_v15 = vmul.f32 %v4385_v42, %v3018_v46  ;;  %v2217_v0 = vpop.f32.mrb[25].mxu0 }
 0x677   : > { %v2276_v48 = vmul.f32 %v4379_v28, %v2217_v0 }
 0x679   : > { %v2288_v47 = vadd.f32 %v2277_v15, %v2276_v48 }
 0x67b   : > { %v3021_v39 = vpop.f32.mrb[30].mxu1 }
 0x67c   : > { %v2227_v2 = vpop.f32.mrb[31].mxu1  ;;  %v2279_v1 = vmul.f32 %v4395_v54, %v3021_v39  ;;  %v1601_v54 = vadd.f32 %v1600_v50, %v4440_v16 }
 0x67d   : > { %v2278_v13 = vmul.f32 %v4389_v53, %v2227_v2  ;;  %v1595_v53 = vrot.slane %v1594_v31, 2 }
 0x67e   : > { %v1602_v6 = vrot.slane %v1601_v54, 2 }
 0x67f   : > { %v2289_v18 = vadd.f32 %v2288_v47, %v2278_v13  ;;  %v3024_v5 = vpop.f32.mrb[32].mxu1  ;;  %v1596_v49 = vadd.f32 %v1595_v53, %v1594_v31 }
 0x680   : > { %v2237_v42 = vpop.f32.mrb[33].mxu1  ;;  %v2281_v14 = vmul.f32 %v4403_v55, %v3024_v5  ;;  %v1607_v55 = vrot.slane %v4444_v62, 4  ;;  %v1603_v63 = vadd.f32 %v1602_v6, %v1601_v54 }
 0x681   : > { %v2290_v8 = vrot.slane %v2289_v18, 4  ;;  %v2280_v28 = vmul.f32 %v4399_v41, %v2237_v42  ;;  %v1597_v16 = vrot.slane %v1596_v49, 1 }
 0x682   : > { %v1608_v26 = vadd.f32 %v1607_v55, %v4444_v62  ;;  %v1604_v40 = vrot.slane %v1603_v63, 1 }
 0x683   : > { %v2291_v10 = vadd.f32 %v2290_v8, %v2289_v18  ;;  %v2296_v24 = vadd.f32 %v2280_v28, %v2279_v1  ;;  %v3027_v27 = vpop.f32.mrb[34].mxu1  ;;  %v1598_v0 = vadd.f32 %v1597_v16, %v1596_v49 }
 0x684   : > { %v2283_v58 = vmul.f32 %v4411_v44, %v3027_v27  ;;  %v2247_v11 = vpop.f32.mrb[35].mxu1  ;;  %v1609_v38 = vrot.slane %v1608_v26, 2  ;;  %v1605_v18 = vadd.f32 %v1604_v40, %v1603_v63 }
 0x685   : > { %v2292_v17 = vrot.slane %v2291_v10, 2  ;;  %v2297_v9 = vadd.f32 %v2296_v24, %v2281_v14  ;;  %v2282_v19 = vmul.f32 %v4407_v43, %v2247_v11 }
 0x686   : > { %v1610_v2 = vadd.f32 %v1609_v38, %v1608_v26 }
 0x687   : > { %v2293_v41 = vadd.f32 %v2292_v17, %v2291_v10  ;;  %v2298_v33 = vrot.slane %v2297_v9, 4  ;;  %v2304_v32 = vadd.f32 %v2283_v58, %v2282_v19  ;;  %v3030_v35 = vpop.f32.mrb[36].mxu1 }
 0x688   : > { %v2257_v23 = vpop.f32.mrb[37].mxu1  ;;  %v2285_v30 = vmul.f32 %v4419_v51, %v3030_v35  ;;  %v1611_v31 = vrot.slane %v1610_v2, 1 }
 0x689   : > { %v2294_v7 = vrot.slane %v2293_v41, 1  ;;  %v2299_v12 = vadd.f32 %v2298_v33, %v2297_v9  ;;  %v2284_v44 = vmul.f32 %v4415_v45, %v2257_v23 }
 0x68a   : > { %v1612_v50 = vadd.f32 %v1611_v31, %v1610_v2 }
 0x68b   : > { %v2295_v36 = vadd.f32 %v2294_v7, %v2293_v41  ;;  %v2300_v59 = vrot.slane %v2299_v12, 2  ;;  %v2305_v43 = vadd.f32 %v2304_v32, %v2284_v44  ;;  %v3033_v3 = vpop.f32.mrb[38].mxu1 }
 0x68c   : > { %v2267_v4 = vpop.f32.mrb[39].mxu1  ;;  %v2287_v46 = vmul.f32 %v4427_v60, %v3033_v3 }
 0x68d   : > { %v2320_v29 = vadd.f32 %v2295_v36, %v1591_v25  ;;  %v2301_v37 = vadd.f32 %v2300_v59, %v2299_v12  ;;  %v2306_v56 = vrot.slane %v2305_v43, 4  ;;  %v2286_v34 = vmul.f32 %v4423_v57, %v2267_v4 }
 0x68f   : > { %v2302_v22 = vrot.slane %v2301_v37, 1  ;;  %v2307_v45 = vadd.f32 %v2306_v56, %v2305_v43  ;;  %v2312_v15 = vadd.f32 %v2286_v34, %v2285_v30 }
 0x691   : > { %v2303_v48 = vadd.f32 %v2302_v22, %v2301_v37  ;;  %v2308_v47 = vrot.slane %v2307_v45, 2  ;;  %v2313_v62 = vadd.f32 %v2312_v15, %v2287_v46 }
 0x693   : > { %v2321_v51 = vadd.f32 %v2303_v48, %v1598_v0  ;;  %v2309_v39 = vadd.f32 %v2308_v47, %v2307_v45  ;;  %v2314_v61 = vrot.slane %v2313_v62, 4 }
 0x695   : > { %v2310_v13 = vrot.slane %v2309_v39, 1  ;;  %v2315_v57 = vadd.f32 %v2314_v61, %v2313_v62  ;;  %v2328_v21 = vsel %vm669_vm1, %v2321_v51, %v2320_v29 }
 0x697   : > { %v2311_v5 = vadd.f32 %v2310_v13, %v2309_v39  ;;  %v2316_v60 = vrot.slane %v2315_v57, 2 }
 0x699   : > { %v2322_v42 = vadd.f32 %v2311_v5, %v1605_v18  ;;  %v2317_v1 = vadd.f32 %v2316_v60, %v2315_v57 }
 0x69b   : > { %v2318_v8 = vrot.slane %v2317_v1, 1  ;;  %v2329_v28 = vsel %vm671_vm2, %v2322_v42, %v2328_v21 }
 0x69d   : > { %v2319_v52 = vadd.f32 %v2318_v8, %v2317_v1 }
 0x69f   : > { %v2323_v10 = vadd.f32 %v2319_v52, %v1612_v50 }
 0x6a1   : > { %v2330_v14 = vsel %vm673_vm3, %v2323_v10, %v2329_v28 }
 0x6a2   : > { %2332 = vst [vmem:[%s571_s2] sm:$0xf] %v2330_v14 }
 0x6a3   : > { %3572 = shalt.err (!%p3569_p9)
}
 0x6a4   : > { %s3573_s3 = scalar_lea.hbm %s4571_s23, 64  ;;  %s3577_s18 = scalar_lea.hbm %s4662_s22, 128 }
 0x6a5   : > { %p3574_p0 = scmp.ne.s32.totalorder %s4571_s23, %s3573_s3  ;;  %p3578_p8 = scmp.lt.u32.totalorder %s4571_s23, %s4662_s22 }
 0x6a6   : > { %p3579_p6 = scmp.lt.u32.totalorder %s3577_s18, %s3573_s3  ;;  %p3581_p5 = scmp.lt.u32.totalorder %s3573_s3, %s4571_s23 }
 0x6a7   : > { %p3575_p11 = pnand %p3574_p0, %p3889_p10 }
 0x6a8   : > { %p3580_p3 = por %p3579_p6, %p3578_p8 }
 0x6a9   : > { %p3576_p4 = pneg %p3575_p11 }
 0x6aa   : > { %p3582_p7 = por %p3581_p5, %p3580_p3 }
 0x6ac   : > { %p3583_p12 = pnand %p3582_p7, %p3576_p4 }
 0x6ae   : > { %3586 = shalt.err (!%p3583_p12)
}
 0x6af   : > { %3263 = dma.vmem_to_hbm [thread:$0]  (%p3889_p10), %s4573_s19, 64, %s4571_s23, %s2334_s15  }
 0x6b0 PF: > { %s4663_s7 = sld [smem:[#allocation16_spill]]  ;;  %s4664_s25 = sld [smem:[#allocation17_spill]] }
 0x6b1   : > { %p4666_p2 = scmp.ge.s32.totalorder %s3633_s28, 2 }
 0x6b6   : > { %s2359_s24 = sand.u32 1, %s4663_s7   ;;  %p4665_p1 = scmp.ne.s32.totalorder %s4664_s25, 0 }
 0x6b7   : > { %s2360_s29 = scalar_lea.sflag [#allocation4], %s2359_s24 }
 0x6b8   : > { %p3283_p13 = pnand %p4666_p2, %p4665_p1 }
 0x6ba   : > { %3616 = dma.done.wait (!%p3283_p13), %s2360_s29, 64  }
 0x6bb   : > { %3618 = vsyncadd (!%p3283_p13), %s2360_s29, 4294967232  ;;  %p28_p9 = scmp.ge.s32.totalorder %s3879_s13, 4   ;;  %s4667_s25 = smov %s3625_s26 }
 0x6bc   : > { %s4668_s26 = smov %s3629_s27  ;;  %s4669_s27 = smov %s3895_s30 }
 0x6bd   : > { %s4670_s28 = smov %s3879_s13  ;;  %30 = sbr.rel (!%p28_p9) target bundleno = 13 (0xd), region = 142 }
 0x6c4   :  { %2365 = vsyncpa [#allocation3], 1 }
 0x6c5   :  { %2367 = vsyncpa [#allocation3 + $0x1], 1 }
 0x6c6   :  { %2368 = vsyncpa [#allocation6], 1 }
 0x6c7   :  { %2369 = vsyncpa [#allocation9], 1 }
 0x6c8   :  { %2370 = vsyncpa [#allocation4], 1 }
 0x6c9   :  { %2372 = vsyncpa [#allocation4 + $0x1], 1 }

</bundles_post_ra>
